<compile_context>
chip_gen: v5e
topology: v5e:2x2
jax: 0.10.0
libtpu: 0.0.40
codegen_flags: <defaults>
</compile_context>

<pallas_src>
import functools
import math

import jax
import jax.numpy as jnp
from jax import lax
from jax.experimental import pallas as pl
from jax.experimental.pallas import tpu as pltpu


def encoder_stack_kernel(mask_ref, x_ref,
                         w_attn_ref, b_attn_ref, wo_ref, small_ref,
                         w1_ref, b1_ref, w2_ref,
                         o_ref, act_ref, *, num_heads):
    l = pl.program_id(1)

    # Load the batch element's activations once (layer 0); afterwards the
    # activation lives in VMEM scratch across the layer axis.
    @pl.when(l == 0)
    def _():
        act_ref[...] = x_ref[0]

    x = act_ref[...]                      # [S, D]
    S, D = x.shape
    H = num_heads
    Dh = D // H
    scale = 1.0 / math.sqrt(Dh)

    # Packed per-layer small params: rows = bo, ln1_g, ln1_b, b2, ln2_g, ln2_b.
    small = small_ref[0]                  # [8, D]
    b_o   = small[0:1, :]
    ln1_g = small[1:2, :]
    ln1_b = small[2:3, :]
    b2    = small[3:4, :]
    ln2_g = small[4:5, :]
    ln2_b = small[5:6, :]

    def layer_norm(v, g, b):
        mu = jnp.mean(v, axis=-1, keepdims=True)
        var = jnp.mean((v - mu) ** 2, axis=-1, keepdims=True)
        return (v - mu) * lax.rsqrt(var + 1e-5) * g + b

    # ---- multi-head self attention -------------------------------------
    qkv = jnp.dot(x, w_attn_ref[0], preferred_element_type=jnp.float32) \
        + b_attn_ref[0]                   # [S, 3D]
    q = qkv[:, :D] * scale                # fold 1/sqrt(Dh) into Q once
    k = qkv[:, D:2 * D]
    v = qkv[:, 2 * D:]

    # Hoisted additive key mask, broadcast once per layer.
    neg_mask = jnp.broadcast_to(mask_ref[0] * (-1e9), (S, S))   # [S, S]

    wo = wo_ref[0]                        # [D, D]
    attn = jnp.broadcast_to(b_o, (S, D))  # start accumulator with output bias
    for h in range(H):                    # static unroll over heads
        sl = slice(h * Dh, (h + 1) * Dh)
        qh, kh, vh = q[:, sl], k[:, sl], v[:, sl]
        # q · kᵀ without materializing the transpose (contract last dims).
        scores = lax.dot_general(qh, kh, (((1,), (1,)), ((), ())),
                                 preferred_element_type=jnp.float32)  # [S, S]
        scores = scores + neg_mask
        m = jnp.max(scores, axis=-1, keepdims=True)
        p = jnp.exp(scores - m)
        p = p * pl.reciprocal(jnp.sum(p, axis=-1, keepdims=True), approx=True)
        head = jnp.dot(p, vh, preferred_element_type=jnp.float32)     # [S, Dh]
        # Accumulate the output projection per head -> no lane concat.
        attn = attn + jnp.dot(head, wo[sl, :],
                              preferred_element_type=jnp.float32)

    # TODO(synk): dropout (p_drop) omitted -- kernel implements eval-mode forward.
    y = layer_norm(x + attn, ln1_g, ln1_b)

    # ---- position-wise FFN ----------------------------------------------
    hid = jnp.maximum(
        jnp.dot(y, w1_ref[0], preferred_element_type=jnp.float32) + b1_ref[0],
        0.0)
    ffn = jnp.dot(hid, w2_ref[0], preferred_element_type=jnp.float32) + b2
    out = layer_norm(y + ffn, ln2_g, ln2_b)

    act_ref[...] = out                    # carry to next layer (VMEM-resident)
    o_ref[0] = out                        # flushed to HBM when batch index changes


def encoder_forward(padding_mask, src, stacked_params, num_heads):
    """src: [B, S, D]; padding_mask: [B, 1, S] (1.0 = padded key)."""
    w_attn, b_attn, w_o, small, w1, b1, w2 = stacked_params
    L = w_attn.shape[0]
    B, S, D = src.shape
    F = w1.shape[-1]

    kernel = functools.partial(encoder_stack_kernel, num_heads=num_heads)
    return pl.pallas_call(
        kernel,
        out_shape=jax.ShapeDtypeStruct((B, S, D), src.dtype),
        grid_spec=pltpu.PrefetchScalarGridSpec(
            num_scalar_prefetch=0,
            grid=(B, L),                                           # batch, layer
            in_specs=[
                pl.BlockSpec((1, 1, S), lambda b, l: (b, 0, 0)),     # padding mask
                pl.BlockSpec((1, S, D), lambda b, l: (b, 0, 0)),     # src
                pl.BlockSpec((1, D, 3 * D), lambda b, l: (l, 0, 0)),  # W_qkv
                pl.BlockSpec((1, 1, 3 * D), lambda b, l: (l, 0, 0)),  # b_qkv
                pl.BlockSpec((1, D, D), lambda b, l: (l, 0, 0)),      # W_o
                pl.BlockSpec((1, 8, D), lambda b, l: (l, 0, 0)),      # packed small params
                pl.BlockSpec((1, D, F), lambda b, l: (l, 0, 0)),      # W1
                pl.BlockSpec((1, 1, F), lambda b, l: (l, 0, 0)),      # b1
                pl.BlockSpec((1, F, D), lambda b, l: (l, 0, 0)),      # W2
            ],
            out_specs=pl.BlockSpec((1, S, D), lambda b, l: (b, 0, 0)),
            scratch_shapes=[pltpu.VMEM((S, D), jnp.float32)],        # resident activation
        ),
        compiler_params=pltpu.CompilerParams(
            dimension_semantics=("parallel", "arbitrary")),
    )(padding_mask, src, w_attn, b_attn, w_o, small, w1, b1, w2)


def init_encoder_params(key, num_layers, d_model, d_ffn):
    """Per-layer weights stacked along a leading layer axis; tiny vectors packed."""
    s = 0.02
    k_attn, k_o, k_1, k_2 = jax.random.split(key, 4)
    w_attn = jax.random.normal(k_attn, (num_layers, d_model, 3 * d_model),
                               jnp.float32) * s                      # Wq|Wk|Wv
    b_attn = jnp.zeros((num_layers, 1, 3 * d_model), jnp.float32)
    w_o = jax.random.normal(k_o, (num_layers, d_model, d_model), jnp.float32) * s
    # Small-param slab rows: 0 b_o, 1 ln1_g, 2 ln1_b, 3 b2, 4 ln2_g, 5 ln2_b, 6-7 pad.
    small = jnp.zeros((num_layers, 8, d_model), jnp.float32)
    small = small.at[:, 1, :].set(1.0)    # ln1 gamma
    small = small.at[:, 4, :].set(1.0)    # ln2 gamma
    w1 = jax.random.normal(k_1, (num_layers, d_model, d_ffn), jnp.float32) * s
    b1 = jnp.zeros((num_layers, 1, d_ffn), jnp.float32)
    w2 = jax.random.normal(k_2, (num_layers, d_ffn, d_model), jnp.float32) * s
    return (w_attn, b_attn, w_o, small, w1, b1, w2)


if __name__ == "__main__":
    num_layers, num_heads = 2, 4
    B, S, d_model, d_ffn = 2, 16, 128, 256   # lane-dense (multiples of 128)

    key = jax.random.PRNGKey(0)
    kx, kp = jax.random.split(key)

    src = jax.random.normal(kx, (B, S, d_model), jnp.float32)
    # padding_mask: 1.0 = padded key position. Pad last two positions of batch 1.
    padding_mask = jnp.zeros((B, 1, S), jnp.float32)
    padding_mask = padding_mask.at[1, 0, -2:].set(1.0)

    params = init_encoder_params(kp, num_layers, d_model, d_ffn)

    out = encoder_forward(padding_mask, src, params, num_heads)
    out = jax.block_until_ready(out)
    assert out.shape == (B, S, d_model)
    assert bool(jnp.all(jnp.isfinite(out)))
    print("KERNEL_OK")
</pallas_src>

<mosaic_0001>
module attributes {stable_mosaic.version = 11 : i64} {
  func.func @encoder_stack_kernel(%arg0: i32, %arg1: i32, %arg2: memref<1x1x16xf32, #tpu.memory_space<vmem>>, %arg3: memref<1x16x128xf32, #tpu.memory_space<vmem>>, %arg4: memref<1x128x384xf32, #tpu.memory_space<vmem>>, %arg5: memref<1x1x384xf32, #tpu.memory_space<vmem>>, %arg6: memref<1x128x128xf32, #tpu.memory_space<vmem>>, %arg7: memref<1x8x128xf32, #tpu.memory_space<vmem>>, %arg8: memref<1x128x256xf32, #tpu.memory_space<vmem>>, %arg9: memref<1x1x256xf32, #tpu.memory_space<vmem>>, %arg10: memref<1x256x128xf32, #tpu.memory_space<vmem>>, %arg11: memref<1x16x128xf32, #tpu.memory_space<vmem>>, %arg12: memref<16x128xf32, #tpu.memory_space<vmem>>) attributes {dimension_semantics = [#tpu.dimension_semantics<parallel>, #tpu.dimension_semantics<arbitrary>], iteration_bounds = array<i64: 2, 2>, scalar_prefetch = 0 : i64, scratch_operands = 1 : i64, tpu.core_type = #tpu.core_type<tc>, window_params = [{transform_indices = @transform_0, window_bounds = array<i64: 1, 1, 16>}, {transform_indices = @transform_1, window_bounds = array<i64: 1, 16, 128>}, {transform_indices = @transform_2, window_bounds = array<i64: 1, 128, 384>}, {transform_indices = @transform_3, window_bounds = array<i64: 1, 1, 384>}, {transform_indices = @transform_4, window_bounds = array<i64: 1, 128, 128>}, {transform_indices = @transform_5, window_bounds = array<i64: 1, 8, 128>}, {transform_indices = @transform_6, window_bounds = array<i64: 1, 128, 256>}, {transform_indices = @transform_7, window_bounds = array<i64: 1, 1, 256>}, {transform_indices = @transform_8, window_bounds = array<i64: 1, 256, 128>}, {transform_indices = @transform_9, window_bounds = array<i64: 1, 16, 128>}]} {
    %c0_i32 = arith.constant 0 : i32
    %0 = arith.cmpi eq, %arg1, %c0_i32 : i32
    %1 = arith.extui %0 : i1 to i32
    %c0_i32_0 = arith.constant 0 : i32
    %2 = arith.cmpi ne, %1, %c0_i32_0 : i32
    scf.if %2 {
      %c0_66 = arith.constant 0 : index
      %c0_67 = arith.constant 0 : index
      %c0_68 = arith.constant 0 : index
      %174 = vector.load %arg3[%c0_66, %c0_67, %c0_68] : memref<1x16x128xf32, #tpu.memory_space<vmem>>, vector<1x16x128xf32>
      %175 = vector.shape_cast %174 : vector<1x16x128xf32> to vector<16x128xf32>
      %c0_69 = arith.constant 0 : index
      %c0_70 = arith.constant 0 : index
      %176 = vector.load %arg12[%c0_69, %c0_70] : memref<16x128xf32, #tpu.memory_space<vmem>>, vector<16x128xf32>
      tpu.vector_store %arg12[%c0_69, %c0_70], %175 {strides = array<i32>} : memref<16x128xf32, #tpu.memory_space<vmem>>, vector<16x128xf32>,
    } else {
    }
    %c0 = arith.constant 0 : index
    %c0_1 = arith.constant 0 : index
    %3 = vector.load %arg12[%c0, %c0_1] : memref<16x128xf32, #tpu.memory_space<vmem>>, vector<16x128xf32>
    %c0_2 = arith.constant 0 : index
    %c0_3 = arith.constant 0 : index
    %c0_4 = arith.constant 0 : index
    %4 = vector.load %arg7[%c0_2, %c0_3, %c0_4] : memref<1x8x128xf32, #tpu.memory_space<vmem>>, vector<1x8x128xf32>
    %5 = vector.shape_cast %4 : vector<1x8x128xf32> to vector<8x128xf32>
    %6 = vector.extract_strided_slice %5 {offsets = [0, 0], sizes = [1, 128], strides = [1, 1]} : vector<8x128xf32> to vector<1x128xf32>
    %7 = vector.extract_strided_slice %5 {offsets = [1, 0], sizes = [1, 128], strides = [1, 1]} : vector<8x128xf32> to vector<1x128xf32>
    %8 = vector.extract_strided_slice %5 {offsets = [2, 0], sizes = [1, 128], strides = [1, 1]} : vector<8x128xf32> to vector<1x128xf32>
    %9 = vector.extract_strided_slice %5 {offsets = [3, 0], sizes = [1, 128], strides = [1, 1]} : vector<8x128xf32> to vector<1x128xf32>
    %10 = vector.extract_strided_slice %5 {offsets = [4, 0], sizes = [1, 128], strides = [1, 1]} : vector<8x128xf32> to vector<1x128xf32>
    %11 = vector.extract_strided_slice %5 {offsets = [5, 0], sizes = [1, 128], strides = [1, 1]} : vector<8x128xf32> to vector<1x128xf32>
    %c0_5 = arith.constant 0 : index
    %c0_6 = arith.constant 0 : index
    %c0_7 = arith.constant 0 : index
    %12 = vector.load %arg4[%c0_5, %c0_6, %c0_7] : memref<1x128x384xf32, #tpu.memory_space<vmem>>, vector<1x128x384xf32>
    %13 = vector.shape_cast %12 : vector<1x128x384xf32> to vector<128x384xf32>
    %cst = arith.constant dense<0.000000e+00> : vector<16x384xf32>
    %14 = tpu.matmul %3, %13, %cst {dimension_numbers = #tpu.dot_dimension_numbers<[1], [0], [0], [1], [0, 0, 1, 1], [], []>} : vector<16x128xf32>, vector<128x384xf32>, vector<16x384xf32> -> vector<16x384xf32>
    %c0_8 = arith.constant 0 : index
    %c0_9 = arith.constant 0 : index
    %c0_10 = arith.constant 0 : index
    %15 = vector.load %arg5[%c0_8, %c0_9, %c0_10] : memref<1x1x384xf32, #tpu.memory_space<vmem>>, vector<1x1x384xf32>
    %16 = vector.shape_cast %15 : vector<1x1x384xf32> to vector<1x384xf32>
    %17 = vector.broadcast %16 : vector<1x384xf32> to vector<16x384xf32>
    %18 = arith.addf %14, %17 : vector<16x384xf32>
    %19 = vector.extract_strided_slice %18 {offsets = [0, 0], sizes = [16, 128], strides = [1, 1]} : vector<16x384xf32> to vector<16x128xf32>
    %cst_11 = arith.constant 0.176776692 : f32
    %20 = vector.broadcast %cst_11 : f32 to vector<16x128xf32>
    %21 = arith.mulf %19, %20 : vector<16x128xf32>
    %22 = vector.extract_strided_slice %18 {offsets = [0, 128], sizes = [16, 128], strides = [1, 1]} : vector<16x384xf32> to vector<16x128xf32>
    %23 = vector.extract_strided_slice %18 {offsets = [0, 256], sizes = [16, 128], strides = [1, 1]} : vector<16x384xf32> to vector<16x128xf32>
    %c0_12 = arith.constant 0 : index
    %c0_13 = arith.constant 0 : index
    %c0_14 = arith.constant 0 : index
    %24 = vector.load %arg2[%c0_12, %c0_13, %c0_14] : memref<1x1x16xf32, #tpu.memory_space<vmem>>, vector<1x1x16xf32>
    %25 = vector.shape_cast %24 : vector<1x1x16xf32> to vector<1x16xf32>
    %cst_15 = arith.constant -1.000000e+09 : f32
    %26 = vector.broadcast %cst_15 : f32 to vector<1x16xf32>
    %27 = arith.mulf %25, %26 : vector<1x16xf32>
    %28 = vector.shape_cast %27 : vector<1x16xf32> to vector<1x16xf32>
    %29 = vector.broadcast %28 : vector<1x16xf32> to vector<16x16xf32>
    %c0_16 = arith.constant 0 : index
    %c0_17 = arith.constant 0 : index
    %c0_18 = arith.constant 0 : index
    %30 = vector.load %arg6[%c0_16, %c0_17, %c0_18] : memref<1x128x128xf32, #tpu.memory_space<vmem>>, vector<1x128x128xf32>
    %31 = vector.shape_cast %30 : vector<1x128x128xf32> to vector<128x128xf32>
    %32 = vector.shape_cast %6 : vector<1x128xf32> to vector<1x128xf32>
    %33 = vector.broadcast %32 : vector<1x128xf32> to vector<16x128xf32>
    %34 = vector.extract_strided_slice %21 {offsets = [0, 0], sizes = [16, 32], strides = [1, 1]} : vector<16x128xf32> to vector<16x32xf32>
    %35 = vector.extract_strided_slice %22 {offsets = [0, 0], sizes = [16, 32], strides = [1, 1]} : vector<16x128xf32> to vector<16x32xf32>
    %36 = vector.extract_strided_slice %23 {offsets = [0, 0], sizes = [16, 32], strides = [1, 1]} : vector<16x128xf32> to vector<16x32xf32>
    %cst_19 = arith.constant dense<0.000000e+00> : vector<16x16xf32>
    %37 = tpu.matmul %34, %35, %cst_19 {dimension_numbers = #tpu.dot_dimension_numbers<[1], [1], [0], [0], [0, 0, 1, 0], [], []>} : vector<16x32xf32>, vector<16x32xf32>, vector<16x16xf32> -> vector<16x16xf32>
    %38 = arith.addf %37, %29 : vector<16x16xf32>
    %cst_20 = arith.constant dense<0xFF800000> : vector<16xf32>
    %39 = vector.multi_reduction <maximumf>, %38, %cst_20 [1] : vector<16x16xf32> to vector<16xf32>
    %40 = vector.shape_cast %39 : vector<16xf32> to vector<16x1xf32>
    %41 = vector.broadcast %40 : vector<16x1xf32> to vector<16x16xf32>
    %42 = arith.subf %38, %41 : vector<16x16xf32>
    %43 = math.exp %42 : vector<16x16xf32>
    %cst_21 = arith.constant dense<0.000000e+00> : vector<16xf32>
    %44 = vector.multi_reduction <add>, %43, %cst_21 [1] : vector<16x16xf32> to vector<16xf32>
    %45 = vector.shape_cast %44 : vector<16xf32> to vector<16x1xf32>
    %46 = tpu.reciprocal %45 {approx = true} : vector<16x1xf32> -> vector<16x1xf32>
    %47 = vector.broadcast %46 : vector<16x1xf32> to vector<16x16xf32>
    %48 = arith.mulf %43, %47 : vector<16x16xf32>
    %cst_22 = arith.constant dense<0.000000e+00> : vector<16x32xf32>
    %49 = tpu.matmul %48, %36, %cst_22 {dimension_numbers = #tpu.dot_dimension_numbers<[1], [0], [0], [1], [0, 0, 1, 1], [], []>} : vector<16x16xf32>, vector<16x32xf32>, vector<16x32xf32> -> vector<16x32xf32>
    %50 = vector.extract_strided_slice %31 {offsets = [0, 0], sizes = [32, 128], strides = [1, 1]} : vector<128x128xf32> to vector<32x128xf32>
    %cst_23 = arith.constant dense<0.000000e+00> : vector<16x128xf32>
    %51 = tpu.matmul %49, %50, %cst_23 {dimension_numbers = #tpu.dot_dimension_numbers<[1], [0], [0], [1], [0, 0, 1, 1], [], []>} : vector<16x32xf32>, vector<32x128xf32>, vector<16x128xf32> -> vector<16x128xf32>
    %52 = arith.addf %33, %51 : vector<16x128xf32>
    %53 = vector.extract_strided_slice %21 {offsets = [0, 32], sizes = [16, 32], strides = [1, 1]} : vector<16x128xf32> to vector<16x32xf32>
    %54 = vector.extract_strided_slice %22 {offsets = [0, 32], sizes = [16, 32], strides = [1, 1]} : vector<16x128xf32> to vector<16x32xf32>
    %55 = vector.extract_strided_slice %23 {offsets = [0, 32], sizes = [16, 32], strides = [1, 1]} : vector<16x128xf32> to vector<16x32xf32>
    %cst_24 = arith.constant dense<0.000000e+00> : vector<16x16xf32>
    %56 = tpu.matmul %53, %54, %cst_24 {dimension_numbers = #tpu.dot_dimension_numbers<[1], [1], [0], [0], [0, 0, 1, 0], [], []>} : vector<16x32xf32>, vector<16x32xf32>, vector<16x16xf32> -> vector<16x16xf32>
    %57 = arith.addf %56, %29 : vector<16x16xf32>
    %cst_25 = arith.constant dense<0xFF800000> : vector<16xf32>
    %58 = vector.multi_reduction <maximumf>, %57, %cst_25 [1] : vector<16x16xf32> to vector<16xf32>
    %59 = vector.shape_cast %58 : vector<16xf32> to vector<16x1xf32>
    %60 = vector.broadcast %59 : vector<16x1xf32> to vector<16x16xf32>
    %61 = arith.subf %57, %60 : vector<16x16xf32>
    %62 = math.exp %61 : vector<16x16xf32>
    %cst_26 = arith.constant dense<0.000000e+00> : vector<16xf32>
    %63 = vector.multi_reduction <add>, %62, %cst_26 [1] : vector<16x16xf32> to vector<16xf32>
    %64 = vector.shape_cast %63 : vector<16xf32> to vector<16x1xf32>
    %65 = tpu.reciprocal %64 {approx = true} : vector<16x1xf32> -> vector<16x1xf32>
    %66 = vector.broadcast %65 : vector<16x1xf32> to vector<16x16xf32>
    %67 = arith.mulf %62, %66 : vector<16x16xf32>
    %cst_27 = arith.constant dense<0.000000e+00> : vector<16x32xf32>
    %68 = tpu.matmul %67, %55, %cst_27 {dimension_numbers = #tpu.dot_dimension_numbers<[1], [0], [0], [1], [0, 0, 1, 1], [], []>} : vector<16x16xf32>, vector<16x32xf32>, vector<16x32xf32> -> vector<16x32xf32>
    %69 = vector.extract_strided_slice %31 {offsets = [32, 0], sizes = [32, 128], strides = [1, 1]} : vector<128x128xf32> to vector<32x128xf32>
    %cst_28 = arith.constant dense<0.000000e+00> : vector<16x128xf32>
    %70 = tpu.matmul %68, %69, %cst_28 {dimension_numbers = #tpu.dot_dimension_numbers<[1], [0], [0], [1], [0, 0, 1, 1], [], []>} : vector<16x32xf32>, vector<32x128xf32>, vector<16x128xf32> -> vector<16x128xf32>
    %71 = arith.addf %52, %70 : vector<16x128xf32>
    %72 = vector.extract_strided_slice %21 {offsets = [0, 64], sizes = [16, 32], strides = [1, 1]} : vector<16x128xf32> to vector<16x32xf32>
    %73 = vector.extract_strided_slice %22 {offsets = [0, 64], sizes = [16, 32], strides = [1, 1]} : vector<16x128xf32> to vector<16x32xf32>
    %74 = vector.extract_strided_slice %23 {offsets = [0, 64], sizes = [16, 32], strides = [1, 1]} : vector<16x128xf32> to vector<16x32xf32>
    %cst_29 = arith.constant dense<0.000000e+00> : vector<16x16xf32>
    %75 = tpu.matmul %72, %73, %cst_29 {dimension_numbers = #tpu.dot_dimension_numbers<[1], [1], [0], [0], [0, 0, 1, 0], [], []>} : vector<16x32xf32>, vector<16x32xf32>, vector<16x16xf32> -> vector<16x16xf32>
    %76 = arith.addf %75, %29 : vector<16x16xf32>
    %cst_30 = arith.constant dense<0xFF800000> : vector<16xf32>
    %77 = vector.multi_reduction <maximumf>, %76, %cst_30 [1] : vector<16x16xf32> to vector<16xf32>
    %78 = vector.shape_cast %77 : vector<16xf32> to vector<16x1xf32>
    %79 = vector.broadcast %78 : vector<16x1xf32> to vector<16x16xf32>
    %80 = arith.subf %76, %79 : vector<16x16xf32>
    %81 = math.exp %80 : vector<16x16xf32>
    %cst_31 = arith.constant dense<0.000000e+00> : vector<16xf32>
    %82 = vector.multi_reduction <add>, %81, %cst_31 [1] : vector<16x16xf32> to vector<16xf32>
    %83 = vector.shape_cast %82 : vector<16xf32> to vector<16x1xf32>
    %84 = tpu.reciprocal %83 {approx = true} : vector<16x1xf32> -> vector<16x1xf32>
    %85 = vector.broadcast %84 : vector<16x1xf32> to vector<16x16xf32>
    %86 = arith.mulf %81, %85 : vector<16x16xf32>
    %cst_32 = arith.constant dense<0.000000e+00> : vector<16x32xf32>
    %87 = tpu.matmul %86, %74, %cst_32 {dimension_numbers = #tpu.dot_dimension_numbers<[1], [0], [0], [1], [0, 0, 1, 1], [], []>} : vector<16x16xf32>, vector<16x32xf32>, vector<16x32xf32> -> vector<16x32xf32>
    %88 = vector.extract_strided_slice %31 {offsets = [64, 0], sizes = [32, 128], strides = [1, 1]} : vector<128x128xf32> to vector<32x128xf32>
    %cst_33 = arith.constant dense<0.000000e+00> : vector<16x128xf32>
    %89 = tpu.matmul %87, %88, %cst_33 {dimension_numbers = #tpu.dot_dimension_numbers<[1], [0], [0], [1], [0, 0, 1, 1], [], []>} : vector<16x32xf32>, vector<32x128xf32>, vector<16x128xf32> -> vector<16x128xf32>
    %90 = arith.addf %71, %89 : vector<16x128xf32>
    %91 = vector.extract_strided_slice %21 {offsets = [0, 96], sizes = [16, 32], strides = [1, 1]} : vector<16x128xf32> to vector<16x32xf32>
    %92 = vector.extract_strided_slice %22 {offsets = [0, 96], sizes = [16, 32], strides = [1, 1]} : vector<16x128xf32> to vector<16x32xf32>
    %93 = vector.extract_strided_slice %23 {offsets = [0, 96], sizes = [16, 32], strides = [1, 1]} : vector<16x128xf32> to vector<16x32xf32>
    %cst_34 = arith.constant dense<0.000000e+00> : vector<16x16xf32>
    %94 = tpu.matmul %91, %92, %cst_34 {dimension_numbers = #tpu.dot_dimension_numbers<[1], [1], [0], [0], [0, 0, 1, 0], [], []>} : vector<16x32xf32>, vector<16x32xf32>, vector<16x16xf32> -> vector<16x16xf32>
    %95 = arith.addf %94, %29 : vector<16x16xf32>
    %cst_35 = arith.constant dense<0xFF800000> : vector<16xf32>
    %96 = vector.multi_reduction <maximumf>, %95, %cst_35 [1] : vector<16x16xf32> to vector<16xf32>
    %97 = vector.shape_cast %96 : vector<16xf32> to vector<16x1xf32>
    %98 = vector.broadcast %97 : vector<16x1xf32> to vector<16x16xf32>
    %99 = arith.subf %95, %98 : vector<16x16xf32>
    %100 = math.exp %99 : vector<16x16xf32>
    %cst_36 = arith.constant dense<0.000000e+00> : vector<16xf32>
    %101 = vector.multi_reduction <add>, %100, %cst_36 [1] : vector<16x16xf32> to vector<16xf32>
    %102 = vector.shape_cast %101 : vector<16xf32> to vector<16x1xf32>
    %103 = tpu.reciprocal %102 {approx = true} : vector<16x1xf32> -> vector<16x1xf32>
    %104 = vector.broadcast %103 : vector<16x1xf32> to vector<16x16xf32>
    %105 = arith.mulf %100, %104 : vector<16x16xf32>
    %cst_37 = arith.constant dense<0.000000e+00> : vector<16x32xf32>
    %106 = tpu.matmul %105, %93, %cst_37 {dimension_numbers = #tpu.dot_dimension_numbers<[1], [0], [0], [1], [0, 0, 1, 1], [], []>} : vector<16x16xf32>, vector<16x32xf32>, vector<16x32xf32> -> vector<16x32xf32>
    %107 = vector.extract_strided_slice %31 {offsets = [96, 0], sizes = [32, 128], strides = [1, 1]} : vector<128x128xf32> to vector<32x128xf32>
    %cst_38 = arith.constant dense<0.000000e+00> : vector<16x128xf32>
    %108 = tpu.matmul %106, %107, %cst_38 {dimension_numbers = #tpu.dot_dimension_numbers<[1], [0], [0], [1], [0, 0, 1, 1], [], []>} : vector<16x32xf32>, vector<32x128xf32>, vector<16x128xf32> -> vector<16x128xf32>
    %109 = arith.addf %90, %108 : vector<16x128xf32>
    %110 = arith.addf %3, %109 : vector<16x128xf32>
    %cst_39 = arith.constant dense<0.000000e+00> : vector<16xf32>
    %111 = vector.multi_reduction <add>, %110, %cst_39 [1] : vector<16x128xf32> to vector<16xf32>
    %112 = vector.shape_cast %111 : vector<16xf32> to vector<16x1xf32>
    %cst_40 = arith.constant 1.280000e+02 : f32
    %113 = vector.broadcast %cst_40 : f32 to vector<16x1xf32>
    %114 = arith.divf %112, %113 : vector<16x1xf32>
    %115 = vector.broadcast %114 : vector<16x1xf32> to vector<16x128xf32>
    %116 = arith.subf %110, %115 : vector<16x128xf32>
    %117 = arith.mulf %116, %116 : vector<16x128xf32>
    %cst_41 = arith.constant dense<0.000000e+00> : vector<16xf32>
    %118 = vector.multi_reduction <add>, %117, %cst_41 [1] : vector<16x128xf32> to vector<16xf32>
    %119 = vector.shape_cast %118 : vector<16xf32> to vector<16x1xf32>
    %cst_42 = arith.constant 1.280000e+02 : f32
    %120 = vector.broadcast %cst_42 : f32 to vector<16x1xf32>
    %121 = arith.divf %119, %120 : vector<16x1xf32>
    %122 = vector.broadcast %114 : vector<16x1xf32> to vector<16x128xf32>
    %123 = arith.subf %110, %122 : vector<16x128xf32>
    %cst_43 = arith.constant 9.99999974E-6 : f32
    %124 = vector.broadcast %cst_43 : f32 to vector<16x1xf32>
    %125 = arith.addf %121, %124 : vector<16x1xf32>
    %126 = math.rsqrt %125 : vector<16x1xf32>
    %127 = vector.broadcast %126 : vector<16x1xf32> to vector<16x128xf32>
    %128 = arith.mulf %123, %127 : vector<16x128xf32>
    %129 = vector.broadcast %7 : vector<1x128xf32> to vector<16x128xf32>
    %130 = arith.mulf %128, %129 : vector<16x128xf32>
    %131 = vector.broadcast %8 : vector<1x128xf32> to vector<16x128xf32>
    %132 = arith.addf %130, %131 : vector<16x128xf32>
    %c0_44 = arith.constant 0 : index
    %c0_45 = arith.constant 0 : index
    %c0_46 = arith.constant 0 : index
    %133 = vector.load %arg8[%c0_44, %c0_45, %c0_46] : memref<1x128x256xf32, #tpu.memory_space<vmem>>, vector<1x128x256xf32>
    %134 = vector.shape_cast %133 : vector<1x128x256xf32> to vector<128x256xf32>
    %cst_47 = arith.constant dense<0.000000e+00> : vector<16x256xf32>
    %135 = tpu.matmul %132, %134, %cst_47 {dimension_numbers = #tpu.dot_dimension_numbers<[1], [0], [0], [1], [0, 0, 1, 1], [], []>} : vector<16x128xf32>, vector<128x256xf32>, vector<16x256xf32> -> vector<16x256xf32>
    %c0_48 = arith.constant 0 : index
    %c0_49 = arith.constant 0 : index
    %c0_50 = arith.constant 0 : index
    %136 = vector.load %arg9[%c0_48, %c0_49, %c0_50] : memref<1x1x256xf32, #tpu.memory_space<vmem>>, vector<1x1x256xf32>
    %137 = vector.shape_cast %136 : vector<1x1x256xf32> to vector<1x256xf32>
    %138 = vector.broadcast %137 : vector<1x256xf32> to vector<16x256xf32>
    %139 = arith.addf %135, %138 : vector<16x256xf32>
    %cst_51 = arith.constant 0.000000e+00 : f32
    %140 = vector.broadcast %cst_51 : f32 to vector<16x256xf32>
    %141 = arith.maximumf %139, %140 : vector<16x256xf32>
    %c0_52 = arith.constant 0 : index
    %c0_53 = arith.constant 0 : index
    %c0_54 = arith.constant 0 : index
    %142 = vector.load %arg10[%c0_52, %c0_53, %c0_54] : memref<1x256x128xf32, #tpu.memory_space<vmem>>, vector<1x256x128xf32>
    %143 = vector.shape_cast %142 : vector<1x256x128xf32> to vector<256x128xf32>
    %cst_55 = arith.constant dense<0.000000e+00> : vector<16x128xf32>
    %144 = tpu.matmul %141, %143, %cst_55 {dimension_numbers = #tpu.dot_dimension_numbers<[1], [0], [0], [1], [0, 0, 1, 1], [], []>} : vector<16x256xf32>, vector<256x128xf32>, vector<16x128xf32> -> vector<16x128xf32>
    %145 = vector.broadcast %9 : vector<1x128xf32> to vector<16x128xf32>
    %146 = arith.addf %144, %145 : vector<16x128xf32>
    %147 = arith.addf %132, %146 : vector<16x128xf32>
    %cst_56 = arith.constant dense<0.000000e+00> : vector<16xf32>
    %148 = vector.multi_reduction <add>, %147, %cst_56 [1] : vector<16x128xf32> to vector<16xf32>
    %149 = vector.shape_cast %148 : vector<16xf32> to vector<16x1xf32>
    %cst_57 = arith.constant 1.280000e+02 : f32
    %150 = vector.broadcast %cst_57 : f32 to vector<16x1xf32>
    %151 = arith.divf %149, %150 : vector<16x1xf32>
    %152 = vector.broadcast %151 : vector<16x1xf32> to vector<16x128xf32>
    %153 = arith.subf %147, %152 : vector<16x128xf32>
    %154 = arith.mulf %153, %153 : vector<16x128xf32>
    %cst_58 = arith.constant dense<0.000000e+00> : vector<16xf32>
    %155 = vector.multi_reduction <add>, %154, %cst_58 [1] : vector<16x128xf32> to vector<16xf32>
    %156 = vector.shape_cast %155 : vector<16xf32> to vector<16x1xf32>
    %cst_59 = arith.constant 1.280000e+02 : f32
    %157 = vector.broadcast %cst_59 : f32 to vector<16x1xf32>
    %158 = arith.divf %156, %157 : vector<16x1xf32>
    %159 = vector.broadcast %151 : vector<16x1xf32> to vector<16x128xf32>
    %160 = arith.subf %147, %159 : vector<16x128xf32>
    %cst_60 = arith.constant 9.99999974E-6 : f32
    %161 = vector.broadcast %cst_60 : f32 to vector<16x1xf32>
    %162 = arith.addf %158, %161 : vector<16x1xf32>
    %163 = math.rsqrt %162 : vector<16x1xf32>
    %164 = vector.broadcast %163 : vector<16x1xf32> to vector<16x128xf32>
    %165 = arith.mulf %160, %164 : vector<16x128xf32>
    %166 = vector.broadcast %10 : vector<1x128xf32> to vector<16x128xf32>
    %167 = arith.mulf %165, %166 : vector<16x128xf32>
    %168 = vector.broadcast %11 : vector<1x128xf32> to vector<16x128xf32>
    %169 = arith.addf %167, %168 : vector<16x128xf32>
    %c0_61 = arith.constant 0 : index
    %c0_62 = arith.constant 0 : index
    %170 = vector.load %arg12[%c0_61, %c0_62] : memref<16x128xf32, #tpu.memory_space<vmem>>, vector<16x128xf32>
    tpu.vector_store %arg12[%c0_61, %c0_62], %169 {strides = array<i32>} : memref<16x128xf32, #tpu.memory_space<vmem>>, vector<16x128xf32>,
    %c0_63 = arith.constant 0 : index
    %c0_64 = arith.constant 0 : index
    %c0_65 = arith.constant 0 : index
    %171 = vector.load %arg11[%c0_63, %c0_64, %c0_65] : memref<1x16x128xf32, #tpu.memory_space<vmem>>, vector<1x16x128xf32>
    %172 = vector.shape_cast %171 : vector<1x16x128xf32> to vector<16x128xf32>
    %173 = vector.shape_cast %169 : vector<16x128xf32> to vector<1x16x128xf32>
    tpu.vector_store %arg11[%c0_63, %c0_64, %c0_65], %173 {strides = array<i32>} : memref<1x16x128xf32, #tpu.memory_space<vmem>>, vector<1x16x128xf32>,
    return
  }
  func.func @transform_0(%arg0: i32, %arg1: i32) -> (i32, i32, i32) {
    %c0_i32 = arith.constant 0 : i32
    %c0_i32_0 = arith.constant 0 : i32
    %c0_i32_1 = arith.constant 0 : i32
    return %arg0, %c0_i32, %c0_i32_0 : i32, i32, i32
  }
  func.func @transform_1(%arg0: i32, %arg1: i32) -> (i32, i32, i32) {
    %c0_i32 = arith.constant 0 : i32
    %c0_i32_0 = arith.constant 0 : i32
    %c0_i32_1 = arith.constant 0 : i32
    return %arg0, %c0_i32, %c0_i32_0 : i32, i32, i32
  }
  func.func @transform_2(%arg0: i32, %arg1: i32) -> (i32, i32, i32) {
    %c0_i32 = arith.constant 0 : i32
    %c0_i32_0 = arith.constant 0 : i32
    %c0_i32_1 = arith.constant 0 : i32
    return %arg1, %c0_i32, %c0_i32_0 : i32, i32, i32
  }
  func.func @transform_3(%arg0: i32, %arg1: i32) -> (i32, i32, i32) {
    %c0_i32 = arith.constant 0 : i32
    %c0_i32_0 = arith.constant 0 : i32
    %c0_i32_1 = arith.constant 0 : i32
    return %arg1, %c0_i32, %c0_i32_0 : i32, i32, i32
  }
  func.func @transform_4(%arg0: i32, %arg1: i32) -> (i32, i32, i32) {
    %c0_i32 = arith.constant 0 : i32
    %c0_i32_0 = arith.constant 0 : i32
    %c0_i32_1 = arith.constant 0 : i32
    return %arg1, %c0_i32, %c0_i32_0 : i32, i32, i32
  }
  func.func @transform_5(%arg0: i32, %arg1: i32) -> (i32, i32, i32) {
    %c0_i32 = arith.constant 0 : i32
    %c0_i32_0 = arith.constant 0 : i32
    %c0_i32_1 = arith.constant 0 : i32
    return %arg1, %c0_i32, %c0_i32_0 : i32, i32, i32
  }
  func.func @transform_6(%arg0: i32, %arg1: i32) -> (i32, i32, i32) {
    %c0_i32 = arith.constant 0 : i32
    %c0_i32_0 = arith.constant 0 : i32
    %c0_i32_1 = arith.constant 0 : i32
    return %arg1, %c0_i32, %c0_i32_0 : i32, i32, i32
  }
  func.func @transform_7(%arg0: i32, %arg1: i32) -> (i32, i32, i32) {
    %c0_i32 = arith.constant 0 : i32
    %c0_i32_0 = arith.constant 0 : i32
    %c0_i32_1 = arith.constant 0 : i32
    return %arg1, %c0_i32, %c0_i32_0 : i32, i32, i32
  }
  func.func @transform_8(%arg0: i32, %arg1: i32) -> (i32, i32, i32) {
    %c0_i32 = arith.constant 0 : i32
    %c0_i32_0 = arith.constant 0 : i32
    %c0_i32_1 = arith.constant 0 : i32
    return %arg1, %c0_i32, %c0_i32_0 : i32, i32, i32
  }
  func.func @transform_9(%arg0: i32, %arg1: i32) -> (i32, i32, i32) {
    %c0_i32 = arith.constant 0 : i32
    %c0_i32_0 = arith.constant 0 : i32
    %c0_i32_1 = arith.constant 0 : i32
    return %arg0, %c0_i32, %c0_i32_0 : i32, i32, i32
  }
}

</mosaic_0001>

<bundles_post_ra>
// kernel: tpu_custom_call.1
= control target key start
LH: loop header
LB: loop body
LE: loop exit
PB: predicated region body
PF: predicated region fallthrough
CT: control target
= control target key end

     0   :  { %s3217_s0 = inlined_call_operand.hbm [shape: f32[2,1,16], index: 0, kind: input, shape index: {}]   ;;  %s3218_s1 = inlined_call_operand.hbm [shape: f32[2,16,128], index: 1, kind: input, shape index: {}]   ;;  %s3219_s2 = inlined_call_operand.hbm [shape: f32[2,128,384], index: 2, kind: input, shape index: {}]   ;;  %s3220_s3 = inlined_call_operand.hbm [shape: f32[2,1,384], index: 3, kind: input, shape index: {}]   ;;  %s3221_s4 = inlined_call_operand.hbm [shape: f32[2,128,128], index: 4, kind: input, shape index: {}]   ;;  %s3222_s5 = inlined_call_operand.hbm [shape: f32[2,8,128], index: 5, kind: input, shape index: {}]   ;;  %s3223_s6 = inlined_call_operand.hbm [shape: f32[2,128,256], index: 6, kind: input, shape index: {}]   ;;  %s3224_s7 = inlined_call_operand.vmem [shape: f32[2,1,256], index: 7, kind: input, shape index: {}]   ;;  %s3225_s8 = inlined_call_operand.hbm [shape: f32[2,256,128], index: 8, kind: input, shape index: {}]   ;;  %s3226_s9 = inlined_call_operand.hbm [shape: f32[2,16,128], index: 9, kind: output, shape index: {}]  }
   0x1   :  { %3253 = sst [smem:[#allocation39_spill]] %s3217_s0 }
   0x2   :  { %3254 = sst [smem:[#allocation40_spill]] %s3218_s1 }
   0x3   :  { %3255 = sst [smem:[#allocation41_spill]] %s3219_s2 }
   0x4   :  { %3256 = sst [smem:[#allocation42_spill]] %s3220_s3 }
   0x5   :  { %3257 = sst [smem:[#allocation43_spill]] %s3221_s4 }
   0x6   :  { %3258 = sst [smem:[#allocation44_spill]] %s3224_s7 }
   0x7   :  { %3259 = sst [smem:[#allocation45_spill]] %s3226_s9 }
   0x8   :  { %14 = vsyncpa [#allocation4], 0 }
   0x9   :  { %16 = vsyncpa [#allocation4 + $0x1], 0 }
   0xa   :  { %17 = vsyncpa [#allocation7], 0 }
   0xb   :  { %19 = vsyncpa [#allocation7 + $0x1], 0 }
   0xc   :  { %20 = vsyncpa [#allocation10], 0 }
   0xd   :  { %22 = vsyncpa [#allocation10 + $0x1], 0 }
   0xe   :  { %23 = vsyncpa [#allocation13], 0 }
   0xf   :  { %25 = vsyncpa [#allocation13 + $0x1], 0 }
  0x10   :  { %26 = vsyncpa [#allocation16], 0 }
  0x11   :  { %28 = vsyncpa [#allocation16 + $0x1], 0 }
  0x12   :  { %29 = vsyncpa [#allocation5], 0 }
  0x13   :  { %31 = vsyncpa [#allocation5 + $0x1], 0  ;;  %s2580_s30 = smov 0   ;;  %s2582_s10 = smov 0  }
  0x14   :  { %s2584_s11 = smov 0   ;;  %s2586_s12 = smov 0  }
  0x15   :  { %s2588_s13 = smov 0   ;;  %s2590_s14 = smov 0  }
  0x16   :  { %s2592_s15 = smov 0   ;;  %s2594_s16 = smov 0  }
  0x17   :  { %s2596_s17 = smov 0   ;;  %s2598_s18 = smov 0  }
  0x18   :  { %s2600_s19 = smov 0  }
  0x19 LB: > { %3260 = sst [smem:[#allocation25_spill]] %s2480_s10  ;;  %s2636_s20 = sadd.s32 4294967295, %s2516_s19   ;;  %s2516_s19 = sphi %s2600_s19, %s37_s19   ;;  %s2512_s18 = sphi %s2598_s18, %s3321_s18   ;;  %s2508_s17 = sphi %s2596_s17, %s3320_s17   ;;  %s2504_s16 = sphi %s2594_s16, %s3319_s16   ;;  %s2500_s15 = sphi %s2592_s15, %s3318_s15   ;;  %s2496_s14 = sphi %s2590_s14, %s3317_s14   ;;  %s2492_s13 = sphi %s2588_s13, %s3316_s13   ;;  %s2488_s12 = sphi %s2586_s12, %s3310_s12   ;;  %s2484_s11 = sphi %s2584_s11, %s3315_s11   ;;  %s2480_s10 = sphi %s2582_s10, %s3314_s10   ;;  %s2476_s30 = sphi %s2580_s30, %s3309_s30  }
  0x1a   : > { %3261 = sst [smem:[#allocation26_spill]] %s2488_s12  ;;  %s1851_s21 = sadd.s32 4294967294, %s2516_s19  }
  0x1b   : > { %3262 = sst [smem:[#allocation27_spill]] %s2492_s13  ;;  %p63_p0 = scmp.ne.s32.totalorder %s2496_s14, %s2492_s13 }
  0x1c   : > { %3263 = sst [smem:[#allocation28_spill]] %s2500_s15  ;;  %p64_p1 = scmp.eq.s32.totalorder %s2516_s19, 0 }
  0x1d   : > { %3264 = sst [smem:[#allocation29_spill]] %s2504_s16  ;;  %p69_p2 = scmp.ne.s32.totalorder %s2492_s13, %s2488_s12 }
  0x1e   : > { %3265 = sst [smem:[#allocation30_spill]] %s2516_s19  ;;  %p70_p3 = scmp.eq.s32.totalorder %s2636_s20, 0 }
  0x1f   : > { %3266 = sst [smem:[#allocation31_spill]] %s2636_s20  ;;  %p65_p4 = por %p64_p1, %p63_p0 }
  0x20   : > { %p301_p5 = scmp.eq.s32.totalorder %s2636_s20, 3  ;;  %p2652_p6 = por %p70_p3, %p69_p2 }
  0x21   : > { %p307_p7 = scmp.eq.s32.totalorder %s1851_s21, 3  ;;  %p3235_p10 = scmp.lt.s32.totalorder %s2516_s19, 4 }
  0x22   : > { %s3267_s24 = scalar_select %p2652_p6, 1, 0 }
  0x23   : > { %p2656_p8 = por %p301_p5, %p63_p0  ;;  %p2660_p9 = por %p307_p7, %p69_p2 }
  0x24   : > { %3268 = sst [smem:[#allocation32_spill]] %s3267_s24  ;;  %s2666_s27 = sand.u32 1, %s2496_s14  }
  0x25   : > { %s3269_s25 = scalar_select %p2656_p8, 1, 0 }
  0x26   : > { %s3271_s26 = scalar_select %p2660_p9, 1, 0 }
  0x27   : > { %3270 = sst [smem:[#allocation33_spill]] %s3269_s25  ;;  %s2669_s28 = sand.u32 1, %s2516_s19  }
  0x28   : > { %3272 = sst [smem:[#allocation34_spill]] %s3271_s26  ;;  %p2673_p11 = pnand %p3235_p10, %p65_p4 }
  0x29   : > { %s1854_s21 = sshll.u32 %s2666_s27, 4  ;;  %s1915_s23 = sshll.u32 %s2512_s18, 4 }
  0x2a   : > { %s3274_s1 = sld [smem:[#allocation40_spill]]  ;;  %s348_s25 = scalar_lea.vmem [#allocation6], %s1854_s21 }
  0x2b   : > { %s356_s9 = sshll.u32 %s348_s25, 4  ;;  %p1869_p12 = scmp.ge.s32.totalorder %s2516_s19, 1  ;;  %s357_s9 = int_to_ptr.vmem [resolvable:$true] %s356_s9 }
  0x2c   : > { %s3241_s7 = scalar_lea.sflag [#allocation7], %s2669_s28  ;;  %s3237_s15 = smov 128  }
  0x2d   : > { %s3239_s24 = smov 8   ;;  %p497_p13 = scmp.lt.s32.totalorder %s2516_s19, 5 }
  0x2e   : > { %s46_s22 = sadd.s32 1, %s2508_s17  ;;  %p115_p4 = scmp.ne.s32.totalorder %s2484_s11, %s2480_s10 }
  0x2f   : > { %p2692_p0 = pnand %p1869_p12, %p497_p13  ;;  %p47_p2 = scmp.ge.s32.totalorder %s46_s22, 2 }
  0x30   : > { %s353_s12 = scalar_lea.hbm %s3274_s1, %s1915_s23  ;;  %s108_s23 = sadd.s32 1, %s2484_s11 }
  0x31   : > { %s354_s16 = sshll.u32 %s353_s12, 4  ;;  %p121_p5 = scmp.ne.s32.totalorder %s2480_s10, %s2476_s30  ;;  %s355_s16 = int_to_ptr.hbm [resolvable:$true] %s354_s16 }
  0x32   : > { %1952 = dma.hbm_to_vmem [thread:$0]  (!%p2673_p11), %s355_s16, 256, %s357_s9, %s3241_s7, %s3237_s15, %s3237_s15, %s3239_s24  }
  0x33   : > { %s2703_s25 = sand.u32 1, %s2484_s11   ;;  %s3323_s22 = smov (%p47_p2, %s46_s22), 0 }
  0x34   : > { %3276 = sst [smem:[#allocation35_spill]] %s3323_s22  ;;  %s3277_s9 = sadd.s32 1, %s2512_s18 }
  0x35   : > { %s3325_s9 = smov (!%p47_p2, %s3277_s9), %s2512_s18  ;;  %s105_s16 = ssub.s32 %s2508_s17, %s3323_s22 }
  0x36   : > { %p117_p7 = por %p115_p4, %p64_p1  ;;  %p51_p12 = scmp.ge.s32.totalorder %s3325_s9, 2 }
  0x37   : > { %p106_p13 = scmp.eq.s32.totalorder %s105_s16, 0  ;;  %p2716_p10 = por %p121_p5, %p70_p3 }
  0x38   : > { %p3280_p9 = scmp.lt.s32.totalorder %s2516_s19, 4  ;;  %s3327_s9 = smov (%p51_p12, %s3325_s9), 0 }
  0x39   : > { %s3278_s26 = scalar_select %p2716_p10, 1, 0 }
  0x3a   : > { %p2722_p8 = pnand %p3280_p9, %p117_p7  ;;  %3282 = sst [smem:[#allocation37_spill]] %s3327_s9 }
  0x3b   : > { %3279 = sst [smem:[#allocation36_spill]] %s3278_s26  ;;  %s53_s16 = ssub.s32 %s2512_s18, %s3327_s9 }
  0x3c   : > { %s2729_s21 = scalar_select %p106_p13, %s2484_s11, %s108_s23  }
  0x3d   : > { %p54_p1 = scmp.eq.s32.totalorder %s53_s16, 0  ;;  %s1924_s15 = smul.u32 3, %s2703_s25 }
  0x3e   : > { %s3283_s24 = sadd.s32 1, %s2496_s14  ;;  %s1925_s1 = smul.u32 3, %s2508_s17 }
  0x3f   : > { %s2737_s7 = scalar_select %p54_p1, %s2496_s14, %s3283_s24  }
  0x40   : > { %s392_s22 = scalar_lea.vmem [#allocation9], %s1924_s15  ;;  %s1861_s26 = sshll.u32 %s2703_s25, 3 }
  0x41   : > { %3284 = sst [smem:[#allocation38_spill]] %s2737_s7  ;;  %s400_s19 = sshll.u32 %s392_s22, 4  ;;  %s401_s19 = int_to_ptr.vmem [resolvable:$true] %s400_s19 }
  0x42   : > { %s3285_s3 = sld [smem:[#allocation42_spill]]  ;;  %s1862_s16 = sshll.u32 %s2508_s17, 3 }
  0x43   : > { %s3251_s9 = scalar_lea.sflag [#allocation10], %s2669_s28  ;;  %s437_s22 = scalar_lea.hbm %s3222_s5, %s1862_s16 }
  0x44   : > { %s433_s7 = scalar_lea.vmem [#allocation12], %s1861_s26  ;;  %s3286_s0 = sld [smem:[#allocation39_spill]] }
  0x45   : > { %s441_s10 = sshll.u32 %s433_s7, 4  ;;  %s330_s15 = scalar_lea.vmem [#allocation3], %s2666_s27  ;;  %s442_s10 = int_to_ptr.vmem [resolvable:$true] %s441_s10 }
  0x46   : > { %s337_s24 = sshll.u32 %s330_s15, 4  ;;  %s328_s7 = scalar_lea.sflag [#allocation4], %s2666_s27  ;;  %s338_s24 = int_to_ptr.vmem [resolvable:$true] %s337_s24 }
  0x47   : > { %s1922_s26 = smul.u32 384, %s2703_s25  ;;  %s3287_s2 = sld [smem:[#allocation41_spill]] }
  0x48   : > { %s396_s13 = scalar_lea.hbm %s3285_s3, %s1925_s1  ;;  %s439_s1 = sshll.u32 %s437_s22, 4  ;;  %s440_s1 = int_to_ptr.hbm [resolvable:$true] %s439_s1 }
  0x49   : > { %s398_s23 = sshll.u32 %s396_s13, 4  ;;  %s3252_s13 = scalar_lea.sflag [#allocation13], %s2669_s28  ;;  %s399_s23 = int_to_ptr.hbm [resolvable:$true] %s398_s23 }
  0x4a   : > { %1958 = dma.hbm_to_vmem [thread:$0]  (!%p2722_p8), %s399_s23, 48, %s401_s19, %s3251_s9  }
  0x4b   : > { %1964 = dma.hbm_to_vmem [thread:$0]  (!%p2722_p8), %s440_s1, 128, %s442_s10, %s3252_s13  }
  0x4c   : > { %s333_s19 = scalar_lea.hbm %s3286_s0, %s2512_s18  ;;  %s1923_s16 = smul.u32 384, %s2508_s17 }
  0x4d   : > { %s335_s23 = sshll.u32 %s333_s19, 4  ;;  %s1858_s22 = sshll.u32 %s2703_s25, 7  ;;  %s336_s23 = int_to_ptr.hbm [resolvable:$true] %s335_s23 }
  0x4e   : > { %1949 = dma.hbm_to_vmem [thread:$0]  (!%p2673_p11), %s336_s23, 16, %s338_s24, %s328_s7  }
  0x4f   : > { %s375_s3 = scalar_lea.hbm %s3287_s2, %s1923_s16  ;;  %s370_s1 = scalar_lea.vmem [#allocation8], %s1922_s26 }
  0x50   : > { %s378_s20 = sshll.u32 %s370_s1, 4  ;;  %s376_s19 = sshll.u32 %s375_s3, 4  ;;  %s379_s20 = int_to_ptr.vmem [resolvable:$true] %s378_s20  ;;  %s377_s19 = int_to_ptr.hbm [resolvable:$true] %s376_s19 }
  0x51   : > { %s2520_s15 = smov 384   ;;  %s2521_s27 = smov 24  }
  0x52   : > { %s3288_s29 = scalar_lea.sflag [#allocation7], %s2669_s28  ;;  %s1916_s23 = sshll.u32 %s2508_s17, 7 }
  0x53   : > { %1955 = dma.hbm_to_vmem [thread:$0]  (!%p2722_p8), %s377_s19, 6144, %s379_s20, %s3288_s29, %s2520_s15, %s2520_s15, %s2521_s27  }
  0x54   : > { %s411_s24 = scalar_lea.vmem [#allocation11], %s1858_s22  ;;  %s3289_s4 = sld [smem:[#allocation43_spill]] }
  0x55   : > { %s419_s7 = sshll.u32 %s411_s24, 4  ;;  %s1863_s10 = sshll.u32 %s2703_s25, 8  ;;  %s420_s7 = int_to_ptr.vmem [resolvable:$true] %s419_s7 }
  0x56   : > { %s3290_s3 = smov 8   ;;  %s3291_s1 = smov 128  }
  0x57   : > { %s3292_s0 = scalar_lea.sflag [#allocation10], %s2669_s28  ;;  %s1917_s20 = sshll.u32 %s2508_s17, 8 }
  0x58   : > { %s452_s22 = scalar_lea.vmem [#allocation14], %s1863_s10  ;;  %s457_s27 = scalar_lea.hbm %s3223_s6, %s1917_s20 }
  0x59   : > { %s460_s19 = sshll.u32 %s452_s22, 4  ;;  %s458_s29 = sshll.u32 %s457_s27, 4  ;;  %s461_s19 = int_to_ptr.vmem [resolvable:$true] %s460_s19  ;;  %s459_s29 = int_to_ptr.hbm [resolvable:$true] %s458_s29 }
  0x5a   : > { %s416_s26 = scalar_lea.hbm %s3289_s4, %s1916_s23  ;;  %s2522_s23 = smov 256  }
  0x5b   : > { %s417_s16 = sshll.u32 %s416_s26, 4  ;;  %s2523_s24 = smov 16   ;;  %s418_s16 = int_to_ptr.hbm [resolvable:$true] %s417_s16 }
  0x5c   : > { %1961 = dma.hbm_to_vmem [thread:$0]  (!%p2722_p8), %s418_s16, 2048, %s420_s7, %s3292_s0, %s3291_s1, %s3291_s1, %s3290_s3  }
  0x5d   : > { %s3293_s9 = scalar_lea.sflag [#allocation13], %s2669_s28  ;;  %s486_s0 = scalar_lea.hbm %s3225_s8, %s1917_s20 }
  0x5e   : > { %1967 = dma.hbm_to_vmem [thread:$0]  (!%p2722_p8), %s459_s29, 4096, %s461_s19, %s3293_s9, %s2522_s23, %s2522_s23, %s2523_s24  }
  0x5f   : > { %s481_s7 = scalar_lea.vmem [#allocation15], %s1863_s10  ;;  %s487_s4 = sshll.u32 %s486_s0, 4  ;;  %s488_s4 = int_to_ptr.hbm [resolvable:$true] %s487_s4 }
  0x60   : > { %s489_s16 = sshll.u32 %s481_s7, 4  ;;  %s478_s22 = scalar_lea.sflag [#allocation16], %s2703_s25  ;;  %s490_s16 = int_to_ptr.vmem [resolvable:$true] %s489_s16 }
  0x61   : > { %1970 = dma.hbm_to_vmem [thread:$0]  (!%p2722_p8), %s488_s4, 4096, %s490_s16, %s478_s22, %s3291_s1, %s3291_s1, %s3290_s3  }
  0x62   : > { %501 = sbr.rel (%p2692_p0) target bundleno = 2445 (0x98d), region = 56  ;;  %s3294_s28 = sld [smem:[#allocation27_spill]] (!%p2692_p0) }
  0x68   : > { %s2808_s15 = sand.u32 1, %s3294_s28  }
  0x69   : > { %s504_s2 = scalar_lea.sflag [#allocation4], %s2808_s15  ;;  %s506_s10 = scalar_lea.vmem [#allocation3], %s2808_s15 }
  0x6a   : > { %2447 = dma.done.wait (%p2652_p6), %s504_s2, 16  }
  0x6b   : > { %2449 = vsyncadd (%p2652_p6), %s504_s2, 4294967280  ;;  %s3296_s25 = sld [smem:[#allocation31_spill]]  ;;  %s1870_s12 = sshll.u32 %s2808_s15, 4 }
  0x6c   : > { %s2820_s3 = scalar_lea.vmem [#allocation6], %s1870_s12 }
  0x71   : > { %s512_s4 = sand.u32 1, %s3296_s25  }
  0x72   : > { %s513_s30 = scalar_lea.sflag [#allocation7], %s512_s4 }
  0x73   : > { %2451 = dma.done.wait (%p2652_p6), %s513_s30, 256  }
  0x74   : > { %2453 = vsyncadd (%p2652_p6), %s513_s30, 4294967040  ;;  %s3297_s1 = sld [smem:[#allocation25_spill]] }
  0x7a   : > { %s524_s13 = sand.u32 1, %s3297_s1  }
  0x7b   : > { %s1926_s27 = smul.u32 384, %s524_s13 }
  0x7d   : > { %s2827_s29 = scalar_lea.vmem [#allocation8], %s1926_s27 }
  0x7e   : > { %2455 = dma.done.wait (%p2716_p10), %s513_s30, 6144  }
  0x7f   : > { %2457 = vsyncadd (%p2716_p10), %s513_s30, 4294961152  ;;  %s1927_s23 = smul.u32 3, %s524_s13  ;;  %s533_s24 = scalar_lea.sflag [#allocation10], %s512_s4 }
  0x81   : > { %s2833_s9 = scalar_lea.vmem [#allocation9], %s1927_s23 }
  0x82   : > { %2459 = dma.done.wait (%p2716_p10), %s533_s24, 2096  }
  0x83   : > { %2461 = vsyncadd (%p2716_p10), %s533_s24, 4294965200  ;;  %s1871_s26 = sshll.u32 %s524_s13, 7  ;;  %s1872_s0 = sshll.u32 %s524_s13, 3 }
  0x84   : > { %s2839_s7 = scalar_lea.vmem [#allocation11], %s1871_s26  ;;  %s553_s16 = scalar_lea.sflag [#allocation13], %s512_s4 }
  0x85   : > { %s2841_s22 = scalar_lea.vmem [#allocation12], %s1872_s0 }
  0x86   : > { %2463 = dma.done.wait (%p2716_p10), %s553_s16, 4224  }
  0x87   : > { %2465 = vsyncadd (%p2716_p10), %s553_s16, 4294963072  ;;  %s1873_s28 = sshll.u32 %s524_s13, 8  ;;  %s573_s2 = scalar_lea.sflag [#allocation16], %s524_s13 }
  0x88   : > { %s2847_s19 = scalar_lea.vmem [#allocation14], %s1873_s28  ;;  %s2849_s25 = scalar_lea.vmem [#allocation15], %s1873_s28 }
  0x89   : > { %2467 = dma.done.wait (%p2716_p10), %s573_s2, 4096  }
  0x8a   : > { %2469 = vsyncadd (%p2716_p10), %s573_s2, 4294963200  ;;  %s3299_s4 = sld [smem:[#allocation28_spill]]  ;;  %s2864_s13 = scalar_lea.vmem [#allocation17], %s1870_s12 }
  0x8b   : > { %s3300_s24 = sld [smem:[#allocation44_spill]] }
  0x90   : > { %p650_p3 = scmp.lt.s32.totalorder %s3299_s4, 1  ;;  %p1877_p6 = scmp.ne.s32.totalorder %s3299_s4, 0 }
  0x92   : > { %s651_s30 = scalar_select %p650_p3, %s3299_s4, 1 }
  0x93   : > { %657 = sbr.rel (%p1877_p6) target bundleno = 155 (0x9b), region = 92 }
  0x94   : > { %s1876_s1 = sshll.u32 %s651_s30, 1 }
  0x95   : > { %s2860_s26 = scalar_lea.vmem %s3300_s24, %s1876_s1 }
  0x98   : > { %v658_v0 = vld [vmem:[%s2820_s3] sm:$0xff]  ;;  %v659_v1 = vld [vmem:[%s2820_s3 + $0x8] sm:$0xff] }
  0x99   : > { %660 = vst [vmem:[#allocation2] sm:$0xff] %v658_v0 }
  0x9a   : > { %661 = vst [vmem:[#allocation2 + $0x8] sm:$0xff] %v659_v1 }
  0x9b PF: > { %v711_v2 = vld [vmem:[%s2827_s29 + $0x170] sm:$0xff]  ;;  %v708_v3 = vld [vmem:[%s2827_s29 + $0x158] sm:$0xff]  ;;  %v710_v4 = vld [vmem:[%s2827_s29 + $0x168] sm:$0xff]  ;;  %s2524_s12 = smov 96   ;;  %vm814_vm0 = vcmask 261120   ;;  %vm850_vm1 = vcmask 130048  }
  0x9c   : > { %744 = vmatpush.msra.mxu1 %v711_v2  ;;  %v705_v5 = vld [vmem:[%s2827_s29 + $0x140] sm:$0xff]  ;;  %721 = vmatpush.msra.mxu0 %v710_v4  ;;  %v707_v6 = vld [vmem:[%s2827_s29 + $0x150] sm:$0xff]  ;;  %v704_v7 = vld [vmem:[%s2827_s29 + $0x138] sm:$0xff]  ;;  %s2526_s3 = smov 64   ;;  %s3301_s20 = sld [smem:[#allocation29_spill]] }
  0x9d   : > { %v702_v8 = vld [vmem:[%s2827_s29 + $0x128] sm:$0xff]  ;;  %v701_v9 = vld [vmem:[%s2827_s29 + $0x120] sm:$0xff]  ;;  %v699_v10 = vld [vmem:[%s2827_s29 + $0x110] sm:$0xff]  ;;  %s1603_s28 = sshll.u32 %s2864_s13, 4  ;;  %s1591_s2 = scalar_lea.sflag [#allocation5], %s2808_s15  ;;  %s1604_s28 = int_to_ptr.vmem [resolvable:$true] %s1603_s28 }
  0x9e   : > { %745 = vmatpush.msra.mxu1 %v708_v3  ;;  %722 = vmatpush.msra.mxu0 %v707_v6  ;;  %v698_v11 = vld [vmem:[%s2827_s29 + $0x108] sm:$0xff]  ;;  %v696_v12 = vld [vmem:[%s2827_s29 + $0xf8] sm:$0xff]  ;;  %v695_v13 = vld [vmem:[%s2827_s29 + $0xf0] sm:$0xff] }
  0x9f   : > { %v693_v14 = vld [vmem:[%s2827_s29 + $0xe0] sm:$0xff]  ;;  %v692_v15 = vld [vmem:[%s2827_s29 + $0xd8] sm:$0xff]  ;;  %v690_v16 = vld [vmem:[%s2827_s29 + $0xc8] sm:$0xff] }
  0xa0   : > { %746 = vmatpush.msra.mxu1 %v705_v5  ;;  %723 = vmatpush.msra.mxu0 %v704_v7  ;;  %v689_v17 = vld [vmem:[%s2827_s29 + $0xc0] sm:$0xff]  ;;  %v687_v18 = vld [vmem:[%s2827_s29 + $0xb0] sm:$0xff]  ;;  %v686_v19 = vld [vmem:[%s2827_s29 + $0xa8] sm:$0xff] }
  0xa1   : > { %v684_v20 = vld [vmem:[%s2827_s29 + $0x98] sm:$0xff]  ;;  %v683_v21 = vld [vmem:[%s2827_s29 + $0x90] sm:$0xff]  ;;  %v681_v22 = vld [vmem:[%s2827_s29 + $0x80] sm:$0xff] }
  0xa2   : > { %747 = vmatpush.msra.mxu1 %v702_v8  ;;  %724 = vmatpush.msra.mxu0 %v701_v9  ;;  %v680_v23 = vld [vmem:[%s2827_s29 + $0x78] sm:$0xff]  ;;  %v678_v24 = vld [vmem:[%s2827_s29 + $0x68] sm:$0xff]  ;;  %v677_v25 = vld [vmem:[%s2827_s29 + $0x60] sm:$0xff] }
  0xa3   : > { %v675_v26 = vld [vmem:[%s2827_s29 + $0x50] sm:$0xff]  ;;  %v674_v27 = vld [vmem:[%s2827_s29 + $0x48] sm:$0xff]  ;;  %v672_v28 = vld [vmem:[%s2827_s29 + $0x38] sm:$0xff] }
  0xa4   : > { %748 = vmatpush.msra.mxu1 %v699_v10  ;;  %725 = vmatpush.msra.mxu0 %v698_v11  ;;  %v671_v29 = vld [vmem:[%s2827_s29 + $0x30] sm:$0xff]  ;;  %v669_v30 = vld [vmem:[%s2827_s29 + $0x20] sm:$0xff]  ;;  %v668_v31 = vld [vmem:[%s2827_s29 + $0x18] sm:$0xff] }
  0xa5   : > { %v666_v32 = vld [vmem:[%s2827_s29 + $0x8] sm:$0xff]  ;;  %v665_v34 = vld [vmem:[%s2827_s29] sm:$0xff]  ;;  %v2905_v35 = vld [vmem:[#allocation2 + $0x8] sm:$0xff] }
  0xa6   : > { %749 = vmatpush.msra.mxu1 %v696_v12  ;;  %726 = vmatpush.msra.mxu0 %v695_v13  ;;  %v2900_v33 = vld [vmem:[#allocation2] sm:$0xff]  ;;  %v2910_v36 = vld [vmem:[%s2833_s9] sm:$0x7]  ;;  %v712_v51 = vld [vmem:[%s2827_s29 + $0x178] sm:$0xff] }
  0xa7   : > { %v715_v37 = vperm.slane %v2910_v36, 0  ;;  %v716_v42 = vperm.slane %v2910_v36, 1  ;;  %v709_v52 = vld [vmem:[%s2827_s29 + $0x160] sm:$0xff]  ;;  %767 = vmatpush.msra.mxu2 %v712_v51  ;;  %v706_v53 = vld [vmem:[%s2827_s29 + $0x148] sm:$0xff]  ;;  %v703_v56 = vld [vmem:[%s2827_s29 + $0x130] sm:$0xff] }
  0xa8   : > { %750 = vmatpush.msra.mxu1 %v693_v14  ;;  %727 = vmatpush.msra.mxu0 %v692_v15  ;;  %v700_v57 = vld [vmem:[%s2827_s29 + $0x118] sm:$0xff]  ;;  %v792_v58 = vld [vmem:[%s506_s10] sm:$0x1]  ;;  %v697_v59 = vld [vmem:[%s2827_s29 + $0x100] sm:$0xff]  ;;  %s2525_s10 = smov 32  }
  0xa9   : > { %768 = vmatpush.msra.mxu2 %v709_v52  ;;  %v694_v60 = vld [vmem:[%s2827_s29 + $0xe8] sm:$0xff]  ;;  %v793_v61 = vmul.f32 -1e+09, %v792_v58  ;;  %v691_v62 = vld [vmem:[%s2827_s29 + $0xd0] sm:$0xff]  ;;  %v688_v63 = vld [vmem:[%s2827_s29 + $0xb8] sm:$0xff] }
  0xaa   : > { %751 = vmatpush.msra.mxu1 %v690_v16  ;;  %728 = vmatpush.msra.mxu0 %v689_v17  ;;  %v685_v1 = vld [vmem:[%s2827_s29 + $0xa0] sm:$0xff]  ;;  %v682_v3 = vld [vmem:[%s2827_s29 + $0x88] sm:$0xff]  ;;  %v679_v5 = vld [vmem:[%s2827_s29 + $0x70] sm:$0xff] }
  0xab   : > { %769 = vmatpush.msra.mxu2 %v706_v53  ;;  %v2955_v0 = vperm.slane %v793_v61, 0  ;;  %v676_v7 = vld [vmem:[%s2827_s29 + $0x58] sm:$0xff]  ;;  %v673_v8 = vld [vmem:[%s2827_s29 + $0x40] sm:$0xff]  ;;  %v670_v10 = vld [vmem:[%s2827_s29 + $0x28] sm:$0xff] }
  0xac   : > { %752 = vmatpush.msra.mxu1 %v687_v18  ;;  %729 = vmatpush.msra.mxu0 %v686_v19  ;;  %v667_v12 = vld [vmem:[%s2827_s29 + $0x10] sm:$0xff]  ;;  %s1919_s29 = sshll.u32 %s3301_s20, 4 }
  0xad   : > { %770 = vmatpush.msra.mxu2 %v703_v56 }
  0xae   : > { %753 = vmatpush.msra.mxu1 %v684_v20  ;;  %730 = vmatpush.msra.mxu0 %v683_v21 }
  0xaf   : > { %771 = vmatpush.msra.mxu2 %v700_v57 }
  0xb0   : > { %754 = vmatpush.msra.mxu1 %v681_v22  ;;  %731 = vmatpush.msra.mxu0 %v680_v23 }
  0xb1   : > { %772 = vmatpush.msra.mxu2 %v697_v59 }
  0xb2   : > { %755 = vmatpush.msra.mxu1 %v678_v24  ;;  %732 = vmatpush.msra.mxu0 %v677_v25 }
  0xb3   : > { %773 = vmatpush.msra.mxu2 %v694_v60 }
  0xb4   : > { %756 = vmatpush.msra.mxu1 %v675_v26  ;;  %733 = vmatpush.msra.mxu0 %v674_v27 }
  0xb5   : > { %774 = vmatpush.msra.mxu2 %v691_v62 }
  0xb6   : > { %757 = vmatpush.msra.mxu1 %v672_v28  ;;  %734 = vmatpush.msra.mxu0 %v671_v29 }
  0xb7   : > { %775 = vmatpush.msra.mxu2 %v688_v63  ;;  %v800_v63 = vld [vmem:[%s2839_s7 + $0x18] sm:$0xff] }
  0xb8   : > { %758 = vmatpush.msra.mxu1 %v669_v30  ;;  %735 = vmatpush.msra.mxu0 %v668_v31  ;;  %v717_v31 = vperm.slane %v2910_v36, 2 }
  0xb9   : > { %776 = vmatpush.msra.mxu2 %v685_v1  ;;  %v799_v1 = vld [vmem:[%s2839_s7 + $0x10] sm:$0xff] }
  0xba   : > { %759 = vmatpush.msra.mxu1 %v666_v32  ;;  %736 = vmatpush.msra.mxu0 %v665_v34  ;;  %v804_v32 = vld [vmem:[%s2839_s7 + $0x38] sm:$0xff] }
  0xbb   : > { %760 = vmatmul.f32.vlgmr.msra.gmra.mxu1 %v2900_v33  ;;  %737 = vmatmul.f32.vlgmr.msra.gmra.mxu0 %v2900_v33 }
  0xbc   : > { %777 = vmatpush.msra.mxu2 %v682_v3  ;;  %v797_v3 = vld [vmem:[%s2839_s7] sm:$0xff] }
  0xbe   : > { %778 = vmatpush.msra.mxu2 %v679_v5 }
  0xc0   : > { %779 = vmatpush.msra.mxu2 %v676_v7 }
  0xc2   : > { %780 = vmatpush.msra.mxu2 %v673_v8 }
  0xc3   : > { %763 = vmatmul.f32.gmra.mxu1 %v2905_v35  ;;  %740 = vmatmul.f32.gmra.mxu0 %v2905_v35 }
  0xc4   : > { %781 = vmatpush.msra.mxu2 %v670_v10 }
  0xc6   : > { %782 = vmatpush.msra.mxu2 %v667_v12 }
  0xc7   : > { %783 = vmatmul.f32.vlgmr.msra.gmra.mxu2 %v2900_v33 }
  0xc8   : > { %1049 = vmatpush.msrb.mxu2 %v804_v32 }
  0xcf   : > { %786 = vmatmul.f32.gmra.mxu2 %v2905_v35 }
 0x138   : > { %v761_v38 = vpop.f32.mrf.mxu1  ;;  %v738_v39 = vpop.f32.mrf.mxu0 }
 0x139   : > { %v739_v40 = vadd.f32 %v738_v39, %v715_v37  ;;  %v2926_v48 = vadd.f32 %v761_v38, %v716_v42 }
 0x13b   : > { %v2913_v41 = vmul.f32 0.17677669, %v739_v40  ;;  %v802_v40 = vld [vmem:[%s2839_s7 + $0x28] sm:$0xff] }
 0x13d   : > { %933 = vrot.lane.b32.xlu1 %v2913_v41, %s2524_s12 }
 0x140   : > { %v764_v43 = vpop.f32.mrf.mxu1  ;;  %v741_v45 = vpop.f32.mrf.mxu0 }
 0x141   : > { %v2918_v44 = vadd.f32 %v764_v43, %v716_v42  ;;  %v742_v46 = vadd.f32 %v741_v45, %v715_v37  ;;  %v803_v37 = vld [vmem:[%s2839_s7 + $0x30] sm:$0xff]  ;;  %v801_v42 = vld [vmem:[%s2839_s7 + $0x20] sm:$0xff] }
 0x142   : > { %1050 = vmatpush.msrb.mxu2 %v803_v37 }
 0x143   : > { %939 = vrot.lane.b32.xlu0 %v2918_v44, %s2524_s12  ;;  %1878 = vmatpush.xpose.msk.msra.mxu3 %vm814_vm0, %v2918_v44  ;;  %v2924_v47 = vmul.f32 0.17677669, %v742_v46 }
 0x144   : > { %1051 = vmatpush.msrb.mxu2 %v802_v40 }
 0x145   : > { %935 = vrot.lane.b32.xlu1 %v2924_v47, %s2524_s12 }
 0x146   : > { %1052 = vmatpush.msrb.mxu2 %v801_v42 }
 0x147   : > { %1879 = vmatpush.xpose.msk.msra.mxu3 %vm814_vm0, %v2926_v48 }
 0x14a   : > { %1880 = vmatmul.msk.f32.vlgmr.msra.gmra.mxu3 %vm814_vm0, %v2913_v41  ;;  %v784_v30 = vpop.f32.mrf.mxu2 }
 0x14b   : > { %937 = vrot.lane.b32.xlu0 %v2926_v48, %s2524_s12  ;;  %v785_v38 = vadd.f32 %v784_v30, %v717_v31 }
 0x152   : > { %1881 = vmatmul.msk.f32.gmra.mxu3 %vm814_vm0, %v2924_v47  ;;  %v787_v34 = vpop.f32.mrf.mxu2 }
 0x153   : > { %v788_v39 = vadd.f32 %v787_v34, %v717_v31 }
 0x155   : > { %893 = vmatpush.msrb.mxu3 %v788_v39  ;;  %v2985_v36 = vpack.i.bf16 %v785_v38, %v788_v39 }
 0x157   : > { %894 = vmatpush.msrb.mxu3 %v785_v38 }
 0x159   : > { %920 = vmatpush.msra.mxu3 %v800_v63 }
 0x15b   : > { %921 = vmatpush.msra.mxu3 %v799_v1 }
 0x1af   : > { %v934_v49 = vpop.permute.xlu1 %933 }
 0x1b5   : > { %v940_v50 = vpop.permute.xlu0 %939 }
 0x1b6   : > { %1886 = vmatpush.xpose.msk.msrb.mxu0 %vm814_vm0, %v940_v50  ;;  %1920 = vmatpush.xpose.msk.msrb.mxu1 %vm814_vm0, %v940_v50 }
 0x1b7   : > { %v936_v55 = vpop.permute.xlu1 %935 }
 0x1bd   : > { %v938_v54 = vpop.permute.xlu0 %937 }
 0x1be   : > { %1887 = vmatpush.xpose.msk.msrb.mxu0 %vm814_vm0, %v938_v54  ;;  %1921 = vmatpush.xpose.msk.msrb.mxu1 %vm814_vm0, %v938_v54 }
 0x1c1   : > { %1888 = vmatmul.msk.f32.vlgmr.msrb.gmra.mxu0 %vm814_vm0, %v934_v49  ;;  %1889 = vmatmul.msk.f32.vlgmr.msrb.gmra.mxu1 %vm814_vm0, %v936_v55 }
 0x1cd   : > { %v844_v2 = vpop.f32.mrf.mxu3 }
 0x1ce   : > { %v845_v4 = vadd.f32 %v844_v2, %v2955_v0  ;;  %v798_v2 = vld [vmem:[%s2839_s7 + $0x8] sm:$0xff] }
 0x1cf   : > { %922 = vmatpush.msra.mxu3 %v798_v2 }
 0x1d0   : > { %v851_v6 = vsel %vm850_vm1, %v845_v4, -inf }
 0x1d1   : > { %852 = vmax.xlane.f32.xlu2 %v851_v6  ;;  %923 = vmatpush.msra.mxu3 %v797_v3 }
 0x1d5   : > { %v847_v9 = vpop.f32.mrf.mxu3 }
 0x1d6   : > { %v848_v11 = vadd.f32 %v847_v9, %v2955_v0 }
 0x1d8   : > { %v854_v13 = vsel %vm850_vm1, %v848_v11, -inf }
 0x1d9   : > { %855 = vmax.xlane.f32.xlu0 %v854_v13 }
 0x23e   : > { %v966_v14 = vpop.f32.mrf.mxu0  ;;  %v969_v15 = vpop.f32.mrf.mxu1 }
 0x23f   : > { %v967_v16 = vadd.f32 %v966_v14, %v2955_v0  ;;  %v970_v17 = vadd.f32 %v969_v15, %v2955_v0 }
 0x241   : > { %v975_v18 = vsel %vm850_vm1, %v970_v17, -inf  ;;  %v972_v19 = vsel %vm850_vm1, %v967_v16, -inf }
 0x242   : > { %976 = vmax.xlane.f32.xlu1 %v975_v18  ;;  %973 = vmax.xlane.f32.xlu2 %v972_v19 }
 0x244   : > { %v853_v20 = vpop.xlane.xlu2 %852 }
 0x245   : > { %v857_v21 = vsub.f32 %v845_v4, %v853_v20 }
 0x247   : > { %v859_v22 = vmul.f32 1.442695, %v857_v21 }
 0x249   : > { %2092 = vpow2.f32 %v859_v22 }
 0x24c   : > { %v856_v23 = vpop.xlane.xlu0 %855 }
 0x24d   : > { %v858_v24 = vsub.f32 %v848_v11, %v856_v23 }
 0x24f   : > { %v2093_v25 = vpop.eup %2092  ;;  %v861_v26 = vmul.f32 1.442695, %v858_v24 }
 0x250   : > { %v863_v27 = vsel %vm850_vm1, %v2093_v25, 0.0 }
 0x251   : > { %2094 = vpow2.f32 %v861_v26  ;;  %864 = vadd.xlane.f32.xlu2 %v863_v27 }
 0x257   : > { %v2095_v28 = vpop.eup %2094 }
 0x258   : > { %v866_v29 = vsel %vm850_vm1, %v2095_v28, 0.0 }
 0x259   : > { %867 = vadd.xlane.f32.xlu2 %v866_v29 }
 0x25b   : > { %1195 = vrot.lane.b32.xlu1 %v2918_v44, %s2525_s10 }
 0x263   : > { %1062 = vrot.lane.b32.xlu1 %v2913_v41, %s2526_s3 }
 0x2b5   : > { %v977_v43 = vpop.xlane.xlu1 %976  ;;  %v974_v45 = vpop.xlane.xlu2 %973 }
 0x2b6   : > { %v979_v46 = vsub.f32 %v970_v17, %v977_v43  ;;  %v978_v49 = vsub.f32 %v967_v16, %v974_v45 }
 0x2b8   : > { %v982_v50 = vmul.f32 1.442695, %v979_v46  ;;  %v980_v51 = vmul.f32 1.442695, %v978_v49 }
 0x2ba   : > { %2096 = vpow2.f32 %v982_v50 }
 0x2bb   : > { %2098 = vpow2.f32 %v980_v51 }
 0x2c0   : > { %v2097_v52 = vpop.eup %2096 }
 0x2c1   : > { %v2099_v53 = vpop.eup %2098  ;;  %v987_v54 = vsel %vm850_vm1, %v2097_v52, 0.0 }
 0x2c2   : > { %988 = vadd.xlane.f32.xlu0 %v987_v54  ;;  %v984_v55 = vsel %vm850_vm1, %v2099_v53, 0.0 }
 0x2c3   : > { %985 = vadd.xlane.f32.xlu2 %v984_v55 }
 0x2c4   : > { %v865_v56 = vpop.xlane.xlu2 %864 }
 0x2c5   : > { %2100 = vrcp.f32 %v865_v56 }
 0x2cb   : > { %v2101_v57 = vpop.eup %2100 }
 0x2cc   : > { %v868_v58 = vpop.xlane.xlu2 %867  ;;  %v871_v59 = vmul.f32 %v2101_v57, %v2093_v25  ;;  %v3026_v25 = vld [vmem:[%s2841_s22] sm:$0xff]  ;;  %s3303_s22 = sld [smem:[#allocation33_spill]] }
 0x2cd   : > { %2102 = vrcp.f32 %v868_v58  ;;  %v1196_v60 = vpop.permute.xlu1 %1195  ;;  %v813_v26 = vperm.slane %v3026_v25, 0 }
 0x2ce   : > { %1882 = vmatmul.msk.f32.vlgmr.msrb.gmra.mxu3 %vm850_vm1, %v871_v59  ;;  %1902 = vmatpush.xpose.msk.msra.mxu2 %vm814_vm0, %v1196_v60 }
 0x2d2   : > { %p3304_p9 = scmp.ne.s32.totalorder %s3303_s22, 0 }
 0x2d3   : > { %v2103_v61 = vpop.eup %2102 }
 0x2d4   : > { %v872_v62 = vmul.f32 %v2103_v61, %v2095_v28 }
 0x2d5   : > { %v1063_v15 = vpop.permute.xlu1 %1062 }
 0x2d6   : > { %1193 = vrot.lane.b32.xlu0 %v2926_v48, %s2525_s10  ;;  %1883 = vmatmul.msk.f32.gmra.mxu3 %vm850_vm1, %v872_v62 }
 0x2db   : > { %2078 = vrot.lane.b32.xlu2 %v2985_v36, %s2524_s12 }
 0x2de   : > { %1191 = vrot.lane.b32.xlu0 %v2924_v47, %s2525_s10 }
 0x2e3   : > { %1068 = vrot.lane.b32.xlu2 %v2918_v44, %s2526_s3 }
 0x2eb   : > { %1189 = vrot.lane.b32.xlu2 %v2913_v41, %s2525_s10 }
 0x2f3   : > { %1066 = vrot.lane.b32.xlu2 %v2926_v48, %s2526_s3 }
 0x2fb   : > { %1064 = vrot.lane.b32.xlu2 %v2924_v47, %s2526_s3 }
 0x335   : > { %v989_v44 = vpop.xlane.xlu0 %988 }
 0x336   : > { %v986_v4 = vpop.xlane.xlu2 %985 }
 0x337   : > { %2104 = vrcp.f32 %v986_v4 }
 0x338   : > { %2106 = vrcp.f32 %v989_v44 }
 0x33d   : > { %v2105_v6 = vpop.eup %2104 }
 0x33e   : > { %v2079_v5 = vpop.permute.xlu2 %2078  ;;  %v992_v48 = vmul.f32 %v2105_v6, %v2099_v53  ;;  %v2107_v8 = vpop.eup %2106 }
 0x33f   : > { %v2080_v41 = vunpack.i.l.bf16 %v2079_v5  ;;  %v2081_v7 = vunpack.i.h.bf16 %v2079_v5  ;;  %v993_v10 = vmul.f32 %v2107_v8, %v2097_v52 }
 0x341   : > { %1022 = vmatpush.msra.mxu1 %v2080_v41 }
 0x343   : > { %1023 = vmatpush.msra.mxu1 %v2081_v7 }
 0x344   : > { %1890 = vmatmul.msk.f32.vlgmr.msra.gmra.mxu1 %vm850_vm1, %v992_v48 }
 0x346   : > { %v1069_v47 = vpop.permute.xlu2 %1068 }
 0x347   : > { %1894 = vmatpush.xpose.msk.msrb.mxu3 %vm814_vm0, %v1069_v47 }
 0x348   : > { %v1194_v9 = vpop.permute.xlu0 %1193 }
 0x349   : > { %1903 = vmatpush.xpose.msk.msra.mxu2 %vm814_vm0, %v1194_v9  ;;  %v808_v9 = vld [vmem:[%s2839_s7 + $0x58] sm:$0xff] }
 0x34a   : > { %1176 = vmatpush.msrb.mxu1 %v808_v9  ;;  %v1386_v9 = vld [vmem:[%s2847_s19 + $0x78] sm:$0xff] }
 0x34c   : > { %1891 = vmatmul.msk.f32.gmra.mxu1 %vm850_vm1, %v993_v10  ;;  %v807_v10 = vld [vmem:[%s2839_s7 + $0x50] sm:$0xff] }
 0x34d   : > { %1177 = vmatpush.msrb.mxu1 %v807_v10  ;;  %v1383_v10 = vld [vmem:[%s2847_s19 + $0x60] sm:$0xff] }
 0x34e   : > { %v1190_v11 = vpop.permute.xlu2 %1189 }
 0x350   : > { %v1192_v20 = vpop.permute.xlu0 %1191 }
 0x351   : > { %v896_v12 = vpop.f32.mrf.mxu3 }
 0x352   : > { %1884 = vmatmul.msk.f32.vlgmr.msra.gmra.mxu3 %vm814_vm0, %v896_v12  ;;  %v805_v12 = vld [vmem:[%s2839_s7 + $0x40] sm:$0xff] }
 0x356   : > { %v1067_v13 = vpop.permute.xlu2 %1066 }
 0x357   : > { %1895 = vmatpush.xpose.msk.msrb.mxu3 %vm814_vm0, %v1067_v13  ;;  %v812_v13 = vld [vmem:[%s2839_s7 + $0x78] sm:$0xff] }
 0x359   : > { %v899_v14 = vpop.f32.mrf.mxu3 }
 0x35a   : > { %1885 = vmatmul.msk.f32.gmra.mxu3 %vm814_vm0, %v899_v14  ;;  %v811_v14 = vld [vmem:[%s2839_s7 + $0x70] sm:$0xff] }
 0x35e   : > { %v1065_v16 = vpop.permute.xlu2 %1064 }
 0x362   : > { %1896 = vmatmul.msk.f32.vlgmr.msrb.gmra.mxu3 %vm814_vm0, %v1063_v15  ;;  %v810_v15 = vld [vmem:[%s2839_s7 + $0x68] sm:$0xff] }
 0x36a   : > { %1897 = vmatmul.msk.f32.gmra.mxu3 %vm814_vm0, %v1065_v16 }
 0x3c1   : > { %v1025_v17 = vpop.f32.mrf.mxu1 }
 0x3c2   : > { %1892 = vmatmul.msk.f32.vlgmr.msrb.gmra.mxu2 %vm814_vm0, %v1025_v17 }
 0x3c9   : > { %v1028_v18 = vpop.f32.mrf.mxu1 }
 0x3ca   : > { %1893 = vmatmul.msk.f32.gmra.mxu2 %vm814_vm0, %v1028_v18 }
 0x3d2   : > { %1904 = vmatmul.msk.f32.vlgmr.msra.gmra.mxu2 %vm814_vm0, %v1190_v11  ;;  %v806_v11 = vld [vmem:[%s2839_s7 + $0x48] sm:$0xff] }
 0x3d3   : > { %1178 = vmatpush.msrb.mxu1 %v806_v11  ;;  %v1384_v11 = vld [vmem:[%s2847_s19 + $0x68] sm:$0xff] }
 0x3d5   : > { %v925_v19 = vpop.f32.mrf.mxu3  ;;  %1179 = vmatpush.msrb.mxu1 %v805_v12  ;;  %v1381_v12 = vld [vmem:[%s2847_s19 + $0x50] sm:$0xff] }
 0x3d6   : > { %v931_v27 = vadd.f32 %v925_v19, %v813_v26 }
 0x3da   : > { %1905 = vmatmul.msk.f32.gmra.mxu2 %vm814_vm0, %v1192_v20 }
 0x3dd   : > { %v928_v21 = vpop.f32.mrf.mxu3 }
 0x3de   : > { %v932_v30 = vadd.f32 %v928_v21, %v813_v26 }
 0x3e5   : > { %v1095_v22 = vpop.f32.mrf.mxu3 }
 0x3e6   : > { %v1096_v23 = vadd.f32 %v1095_v22, %v2955_v0 }
 0x3e8   : > { %v1101_v24 = vsel %vm850_vm1, %v1096_v23, -inf }
 0x3e9   : > { %1102 = vmax.xlane.f32.xlu0 %v1101_v24 }
 0x3ed   : > { %v1098_v39 = vpop.f32.mrf.mxu3 }
 0x3ee   : > { %v1099_v40 = vadd.f32 %v1098_v39, %v2955_v0 }
 0x3f0   : > { %v1104_v51 = vsel %vm850_vm1, %v1099_v40, -inf }
 0x445   : > { %v1054_v28 = vpop.f32.mrf.mxu2 }
 0x446   : > { %v3029_v29 = vadd.f32 %v1054_v28, %v931_v27  ;;  %v809_v27 = vld [vmem:[%s2839_s7 + $0x60] sm:$0xff]  ;;  %s3302_s7 = sld [smem:[#allocation45_spill]] }
 0x44c   : > { %s1602_s16 = scalar_lea.hbm %s3302_s7, %s1919_s29  ;;  %s2394_s27 = scalar_lea.hbm %s3302_s7, 32 }
 0x44d   : > { %v1057_v31 = vpop.f32.mrf.mxu2 }
 0x44e   : > { %v3031_v32 = vadd.f32 %v1057_v31, %v932_v30 }
 0x455   : > { %v1222_v34 = vpop.f32.mrf.mxu2 }
 0x456   : > { %v1223_v37 = vadd.f32 %v1222_v34, %v2955_v0 }
 0x458   : > { %v1228_v38 = vsel %vm850_vm1, %v1223_v37, -inf }
 0x459   : > { %1229 = vmax.xlane.f32.xlu1 %v1228_v38 }
 0x45c   : > { %v1103_v42 = vpop.xlane.xlu0 %1102 }
 0x45d   : > { %v1107_v43 = vsub.f32 %v1096_v23, %v1103_v42  ;;  %v1225_v45 = vpop.f32.mrf.mxu2 }
 0x45e   : > { %v1226_v46 = vadd.f32 %v1225_v45, %v2955_v0 }
 0x45f   : > { %v1109_v49 = vmul.f32 1.442695, %v1107_v43 }
 0x460   : > { %v1231_v50 = vsel %vm850_vm1, %v1226_v46, -inf }
 0x461   : > { %2108 = vpow2.f32 %v1109_v49  ;;  %1232 = vmax.xlane.f32.xlu2 %v1231_v50  ;;  %1105 = vmax.xlane.f32.xlu1 %v1104_v51  ;;  %v2527_v50 = vmov 128.0  }
 0x467   : > { %v2109_v52 = vpop.eup %2108 }
 0x468   : > { %v1113_v53 = vsel %vm850_vm1, %v2109_v52, 0.0 }
 0x469   : > { %1114 = vadd.xlane.f32.xlu2 %v1113_v53  ;;  %v1401_v53 = vld [vmem:[%s2847_s19 + $0xf0] sm:$0xff] }
 0x46a   : > { %1409 = vmatpush.msra.mxu1 %v1401_v53  ;;  %v1469_v53 = vld [vmem:[%s2849_s25 + $0x50] sm:$0xff] }
 0x47a   : > { %2083 = vrot.lane.b32.xlu1 %v2985_v36, %s2525_s10 }
 0x481   : > { %2088 = vrot.lane.b32.xlu2 %v2985_v36, %s2526_s3 }
 0x4cc   : > { %v1230_v54 = vpop.xlane.xlu1 %1229 }
 0x4cd   : > { %v1234_v0 = vsub.f32 %v1223_v37, %v1230_v54  ;;  %v1402_v54 = vld [vmem:[%s2847_s19 + $0xf8] sm:$0xff] }
 0x4ce   : > { %1432 = vmatpush.msrb.mxu2 %v1402_v54 }
 0x4cf   : > { %v1236_v55 = vmul.f32 1.442695, %v1234_v0  ;;  %v1399_v0 = vld [vmem:[%s2847_s19 + $0xe0] sm:$0xff] }
 0x4d0   : > { %1410 = vmatpush.msra.mxu1 %v1399_v0  ;;  %v1485_v0 = vld [vmem:[%s2849_s25 + $0xd0] sm:$0xff] }
 0x4d1   : > { %2110 = vpow2.f32 %v1236_v55 }
 0x4d4   : > { %v1233_v56 = vpop.xlane.xlu2 %1232  ;;  %v1106_v57 = vpop.xlane.xlu1 %1105 }
 0x4d5   : > { %v1235_v58 = vsub.f32 %v1226_v46, %v1233_v56  ;;  %v1108_v59 = vsub.f32 %v1099_v40, %v1106_v57 }
 0x4d7   : > { %v2111_v60 = vpop.eup %2110  ;;  %v1238_v61 = vmul.f32 1.442695, %v1235_v58  ;;  %v1111_v63 = vmul.f32 1.442695, %v1108_v59 }
 0x4d8   : > { %v1240_v62 = vsel %vm850_vm1, %v2111_v60, 0.0 }
 0x4d9   : > { %2112 = vpow2.f32 %v1238_v61  ;;  %1241 = vadd.xlane.f32.xlu0 %v1240_v62 }
 0x4da   : > { %2114 = vpow2.f32 %v1111_v63 }
 0x4dc   : > { %v1115_v1 = vpop.xlane.xlu2 %1114 }
 0x4dd   : > { %2116 = vrcp.f32 %v1115_v1  ;;  %v1397_v1 = vld [vmem:[%s2847_s19 + $0xd0] sm:$0xff] }
 0x4de   : > { %1411 = vmatpush.msra.mxu1 %v1397_v1  ;;  %v1368_v1 = vperm.slane %v3026_v25, 2 }
 0x4df   : > { %v2113_v2 = vpop.eup %2112 }
 0x4e0   : > { %v1243_v36 = vsel %vm850_vm1, %v2113_v2, 0.0  ;;  %v2115_v3 = vpop.eup %2114 }
 0x4e1   : > { %1244 = vadd.xlane.f32.xlu0 %v1243_v36  ;;  %v1116_v7 = vsel %vm850_vm1, %v2115_v3, 0.0  ;;  %v1395_v36 = vld [vmem:[%s2847_s19 + $0xc0] sm:$0xff] }
 0x4e2   : > { %1412 = vmatpush.msra.mxu1 %v1395_v36 }
 0x4e3   : > { %v2117_v44 = vpop.eup %2116 }
 0x4e4   : > { %v2089_v4 = vpop.permute.xlu2 %2088  ;;  %v1121_v41 = vmul.f32 %v2117_v44, %v2109_v52  ;;  %v1394_v44 = vld [vmem:[%s2847_s19 + $0xb8] sm:$0xff] }
 0x4e5   : > { %v2090_v5 = vunpack.i.l.bf16 %v2089_v4  ;;  %v2091_v6 = vunpack.i.h.bf16 %v2089_v4  ;;  %v1393_v4 = vld [vmem:[%s2847_s19 + $0xb0] sm:$0xff] }
 0x4e6   : > { %1413 = vmatpush.msra.mxu1 %v1393_v4 }
 0x4e7   : > { %1149 = vmatpush.msra.mxu0 %v2090_v5  ;;  %v1391_v5 = vld [vmem:[%s2847_s19 + $0xa0] sm:$0xff] }
 0x4e8   : > { %1414 = vmatpush.msra.mxu1 %v1391_v5 }
 0x4e9   : > { %1117 = vadd.xlane.f32.xlu0 %v1116_v7  ;;  %1150 = vmatpush.msra.mxu0 %v2091_v6  ;;  %v1392_v6 = vld [vmem:[%s2847_s19 + $0xa8] sm:$0xff]  ;;  %v1390_v7 = vld [vmem:[%s2847_s19 + $0x98] sm:$0xff] }
 0x4ea   : > { %1898 = vmatmul.msk.f32.vlgmr.msra.gmra.mxu0 %vm850_vm1, %v1121_v41  ;;  %v1389_v41 = vld [vmem:[%s2847_s19 + $0x90] sm:$0xff] }
 0x4eb   : > { %1303 = vmatpush.msrb.mxu0 %v812_v13  ;;  %1415 = vmatpush.msra.mxu1 %v1389_v41  ;;  %v1382_v13 = vld [vmem:[%s2847_s19 + $0x58] sm:$0xff]  ;;  %v1464_v41 = vld [vmem:[%s2849_s25 + $0x28] sm:$0xff] }
 0x4ec   : > { %v2084_v48 = vpop.permute.xlu1 %2083 }
 0x4ed   : > { %v2085_v47 = vunpack.i.l.bf16 %v2084_v48  ;;  %v2086_v8 = vunpack.i.h.bf16 %v2084_v48  ;;  %1304 = vmatpush.msrb.mxu0 %v811_v14  ;;  %v1387_v48 = vld [vmem:[%s2847_s19 + $0x80] sm:$0xff] }
 0x4ee   : > { %1416 = vmatpush.msra.mxu1 %v1387_v48  ;;  %v1379_v14 = vld [vmem:[%s2847_s19 + $0x40] sm:$0xff] }
 0x4ef   : > { %1276 = vmatpush.msra.mxu3 %v2085_v47  ;;  %1305 = vmatpush.msrb.mxu0 %v810_v15  ;;  %v1388_v47 = vld [vmem:[%s2847_s19 + $0x88] sm:$0xff]  ;;  %v1463_v48 = vld [vmem:[%s2849_s25 + $0x20] sm:$0xff] }
 0x4f0   : > { %v1380_v15 = vld [vmem:[%s2847_s19 + $0x48] sm:$0xff] }
 0x4f1   : > { %1277 = vmatpush.msra.mxu3 %v2086_v8  ;;  %1306 = vmatpush.msrb.mxu0 %v809_v27  ;;  %v1385_v8 = vld [vmem:[%s2847_s19 + $0x70] sm:$0xff] }
 0x4f2   : > { %1417 = vmatpush.msra.mxu1 %v1385_v8  ;;  %v1462_v8 = vld [vmem:[%s2849_s25 + $0x18] sm:$0xff] }
 0x4f4   : > { %1418 = vmatpush.msra.mxu1 %v1383_v10 }
 0x4f6   : > { %1419 = vmatpush.msra.mxu1 %v1381_v12 }
 0x4f8   : > { %1420 = vmatpush.msra.mxu1 %v1379_v14  ;;  %v1461_v14 = vld [vmem:[%s2849_s25 + $0x10] sm:$0xff] }
 0x54c   : > { %v1242_v16 = vpop.xlane.xlu0 %1241 }
 0x54d   : > { %2118 = vrcp.f32 %v1242_v16  ;;  %v1377_v16 = vld [vmem:[%s2847_s19 + $0x30] sm:$0xff] }
 0x54e   : > { %1421 = vmatpush.msra.mxu1 %v1377_v16  ;;  %v1460_v16 = vld [vmem:[%s2849_s25 + $0x8] sm:$0xff] }
 0x553   : > { %v2119_v17 = vpop.eup %2118 }
 0x554   : > { %v1248_v18 = vmul.f32 %v2119_v17, %v2111_v60  ;;  %v1245_v19 = vpop.xlane.xlu0 %1244  ;;  %v1378_v17 = vld [vmem:[%s2847_s19 + $0x38] sm:$0xff] }
 0x555   : > { %2120 = vrcp.f32 %v1245_v19  ;;  %v1376_v19 = vld [vmem:[%s2847_s19 + $0x28] sm:$0xff] }
 0x556   : > { %1906 = vmatmul.msk.f32.vlgmr.msra.gmra.mxu3 %vm850_vm1, %v1248_v18  ;;  %v1375_v18 = vld [vmem:[%s2847_s19 + $0x20] sm:$0xff] }
 0x557   : > { %1422 = vmatpush.msra.mxu1 %v1375_v18  ;;  %v1459_v18 = vld [vmem:[%s2849_s25] sm:$0xff] }
 0x55b   : > { %v2121_v20 = vpop.eup %2120 }
 0x55c   : > { %v1118_v21 = vpop.xlane.xlu0 %1117  ;;  %v1249_v22 = vmul.f32 %v2121_v20, %v2113_v2  ;;  %v1398_v2 = vld [vmem:[%s2847_s19 + $0xd8] sm:$0xff]  ;;  %v1373_v20 = vld [vmem:[%s2847_s19 + $0x10] sm:$0xff] }
 0x55d   : > { %2122 = vrcp.f32 %v1118_v21  ;;  %v1374_v21 = vld [vmem:[%s2847_s19 + $0x18] sm:$0xff]  ;;  %1423 = vmatpush.msra.mxu1 %v1373_v20  ;;  %v1476_v20 = vld [vmem:[%s2849_s25 + $0x88] sm:$0xff] }
 0x55e   : > { %1907 = vmatmul.msk.f32.gmra.mxu3 %vm850_vm1, %v1249_v22  ;;  %2124 = vrcp.f32 %v2527_v50  ;;  %v1371_v22 = vld [vmem:[%s2847_s19] sm:$0xff] }
 0x55f   : > { %1424 = vmatpush.msra.mxu1 %v1371_v22  ;;  %v1403_v22 = vld [vmem:[%s2860_s26] sm:$0x3] }
 0x563   : > { %v2123_v23 = vpop.eup %2122 }
 0x564   : > { %v1122_v24 = vmul.f32 %v2123_v23, %v2115_v3  ;;  %v1396_v3 = vld [vmem:[%s2847_s19 + $0xc8] sm:$0xff] }
 0x565   : > { %v1372_v23 = vld [vmem:[%s2847_s19 + $0x8] sm:$0xff] }
 0x566   : > { %1899 = vmatmul.msk.f32.gmra.mxu0 %vm850_vm1, %v1122_v24 }
 0x567   : > { %v1152_v26 = vpop.f32.mrf.mxu0 }
 0x568   : > { %1900 = vmatmul.msk.f32.vlgmr.msrb.gmra.mxu1 %vm814_vm0, %v1152_v26 }
 0x5d9   : > { %v1279_v28 = vpop.f32.mrf.mxu3 }
 0x5da   : > { %1908 = vmatmul.msk.f32.vlgmr.msrb.gmra.mxu0 %vm814_vm0, %v1279_v28  ;;  %v1474_v28 = vld [vmem:[%s2849_s25 + $0x78] sm:$0xff] }
 0x5db   : > { %1492 = vmatpush.msrb.mxu3 %v1474_v28  ;;  %v1406_v28 = vperm.slane %v1403_v22, 1 }
 0x5e1   : > { %v1282_v30 = vpop.f32.mrf.mxu3 }
 0x5e2   : > { %1909 = vmatmul.msk.f32.gmra.mxu0 %vm814_vm0, %v1282_v30  ;;  %v1473_v30 = vld [vmem:[%s2849_s25 + $0x70] sm:$0xff] }
 0x5e3   : > { %v1155_v31 = vpop.f32.mrf.mxu0  ;;  %1493 = vmatpush.msrb.mxu3 %v1473_v30 }
 0x5e4   : > { %1901 = vmatmul.msk.f32.gmra.mxu1 %vm814_vm0, %v1155_v31  ;;  %v1490_v31 = vld [vmem:[%s2849_s25 + $0xf8] sm:$0xff] }
 0x5e5   : > { %v1181_v34 = vpop.f32.mrf.mxu1  ;;  %1515 = vmatpush.msra.mxu0 %v1490_v31 }
 0x5e6   : > { %v1187_v37 = vadd.f32 %v1181_v34, %v3029_v29  ;;  %v2125_v29 = vpop.eup %2124 }
 0x5e7   : > { %v1323_v51 = vmul.f32 128.0, %v2125_v29  ;;  %vm1327_vm2 = vweird.f32 %v2125_v29 }
 0x5e9   : > { %v1324_v52 = vsub.f32 1.0, %v1323_v51 }
 0x5eb   : > { %v1325_v55 = vmul.f32 %v2125_v29, %v1324_v52  ;;  %v1486_v52 = vld [vmem:[%s2849_s25 + $0xd8] sm:$0xff] }
 0x657   : > { %v1308_v38 = vpop.f32.mrf.mxu0 }
 0x658   : > { %v1314_v39 = vadd.f32 %v1308_v38, %v1187_v37  ;;  %v1472_v37 = vld [vmem:[%s2849_s25 + $0x68] sm:$0xff]  ;;  %v1489_v38 = vld [vmem:[%s2849_s25 + $0xf0] sm:$0xff] }
 0x659   : > { %1516 = vmatpush.msra.mxu0 %v1489_v38  ;;  %1494 = vmatpush.msrb.mxu3 %v1472_v37 }
 0x65a   : > { %v1316_v40 = vadd.f32 %v1314_v39, %v2900_v33  ;;  %v1400_v33 = vld [vmem:[%s2847_s19 + $0xe8] sm:$0xff]  ;;  %s1605_s19 = sshll.u32 %s1602_s16, 4  ;;  %s1606_s19 = int_to_ptr.hbm [resolvable:$true] %s1605_s19 }
 0x65b   : > { %1433 = vmatpush.msrb.mxu2 %v1400_v33  ;;  %v1468_v33 = vld [vmem:[%s2849_s25 + $0x48] sm:$0xff] }
 0x65c   : > { %1318 = vadd.xlane.f32.xlu0 %v1316_v40 }
 0x65d   : > { %1434 = vmatpush.msrb.mxu2 %v1398_v2  ;;  %v1466_v2 = vld [vmem:[%s2849_s25 + $0x38] sm:$0xff] }
 0x65f   : > { %v1311_v45 = vpop.f32.mrf.mxu0  ;;  %1435 = vmatpush.msrb.mxu2 %v1396_v3  ;;  %v1482_v3 = vld [vmem:[%s2849_s25 + $0xb8] sm:$0xff] }
 0x661   : > { %v1184_v42 = vpop.f32.mrf.mxu1  ;;  %1436 = vmatpush.msrb.mxu2 %v1394_v44  ;;  %v1465_v44 = vld [vmem:[%s2849_s25 + $0x30] sm:$0xff] }
 0x662   : > { %v1188_v43 = vadd.f32 %v1184_v42, %v3031_v32  ;;  %v1326_v32 = vadd.f32 %v2125_v29, %v1325_v55  ;;  %v1488_v42 = vld [vmem:[%s2849_s25 + $0xe8] sm:$0xff] }
 0x663   : > { %1437 = vmatpush.msrb.mxu2 %v1392_v6  ;;  %1517 = vmatpush.msra.mxu0 %v1488_v42 }
 0x664   : > { %v1315_v46 = vadd.f32 %v1311_v45, %v1188_v43  ;;  %v1471_v45 = vld [vmem:[%s2849_s25 + $0x60] sm:$0xff] }
 0x665   : > { %1438 = vmatpush.msrb.mxu2 %v1390_v7  ;;  %1495 = vmatpush.msrb.mxu3 %v1471_v45  ;;  %v1481_v7 = vld [vmem:[%s2849_s25 + $0xb0] sm:$0xff]  ;;  %v1491_v45 = vperm.slane %v3026_v25, 3 }
 0x666   : > { %v1317_v49 = vadd.f32 %v1315_v46, %v2905_v35  ;;  %v3071_v35 = vsel %vm1327_vm2, %v2125_v29, %v1326_v32  ;;  %v1470_v29 = vld [vmem:[%s2849_s25 + $0x58] sm:$0xff]  ;;  %v1484_v32 = vld [vmem:[%s2849_s25 + $0xc8] sm:$0xff] }
 0x667   : > { %1439 = vmatpush.msrb.mxu2 %v1388_v47  ;;  %1496 = vmatpush.msrb.mxu3 %v1470_v29 }
 0x668   : > { %1320 = vadd.xlane.f32.xlu1 %v1317_v49 }
 0x669   : > { %1440 = vmatpush.msrb.mxu2 %v1386_v9  ;;  %1497 = vmatpush.msrb.mxu3 %v1469_v53 }
 0x66b   : > { %1441 = vmatpush.msrb.mxu2 %v1384_v11  ;;  %1498 = vmatpush.msrb.mxu3 %v1468_v33 }
 0x66d   : > { %1442 = vmatpush.msrb.mxu2 %v1382_v13 }
 0x66f   : > { %1443 = vmatpush.msrb.mxu2 %v1380_v15  ;;  %v1480_v15 = vld [vmem:[%s2849_s25 + $0xa8] sm:$0xff] }
 0x671   : > { %1444 = vmatpush.msrb.mxu2 %v1378_v17  ;;  %v1479_v17 = vld [vmem:[%s2849_s25 + $0xa0] sm:$0xff] }
 0x673   : > { %1445 = vmatpush.msrb.mxu2 %v1376_v19  ;;  %v1478_v19 = vld [vmem:[%s2849_s25 + $0x98] sm:$0xff] }
 0x675   : > { %1446 = vmatpush.msrb.mxu2 %v1374_v21  ;;  %v1475_v21 = vld [vmem:[%s2849_s25 + $0x80] sm:$0xff] }
 0x677   : > { %1447 = vmatpush.msrb.mxu2 %v1372_v23  ;;  %v1405_v23 = vperm.slane %v1403_v22, 0 }
 0x6cf   : > { %v1319_v56 = vpop.xlane.xlu0 %1318 }
 0x6d0   : > { %v1329_v57 = vmul.f32 %v3071_v35, %v1319_v56  ;;  %v1365_v56 = vperm.slane %v3026_v25, 1 }
 0x6d2   : > { %v3074_v58 = vsub.f32 %v1316_v40, %v1329_v57  ;;  %v1467_v57 = vld [vmem:[%s2849_s25 + $0x40] sm:$0xff] }
 0x6d3   : > { %1499 = vmatpush.msrb.mxu3 %v1467_v57 }
 0x6d4   : > { %v1333_v59 = vmul.f32 %v3074_v58, %v3074_v58 }
 0x6d5   : > { %1500 = vmatpush.msrb.mxu3 %v1466_v2 }
 0x6d6   : > { %1335 = vadd.xlane.f32.xlu0 %v1333_v59 }
 0x6d7   : > { %1501 = vmatpush.msrb.mxu3 %v1465_v44 }
 0x6d9   : > { %1502 = vmatpush.msrb.mxu3 %v1464_v41 }
 0x6db   : > { %v1321_v60 = vpop.xlane.xlu1 %1320  ;;  %1503 = vmatpush.msrb.mxu3 %v1463_v48 }
 0x6dc   : > { %v1330_v61 = vmul.f32 %v3071_v35, %v1321_v60  ;;  %v1483_v60 = vld [vmem:[%s2849_s25 + $0xc0] sm:$0xff] }
 0x6dd   : > { %1504 = vmatpush.msrb.mxu3 %v1462_v8 }
 0x6de   : > { %v3079_v62 = vsub.f32 %v1317_v49, %v1330_v61  ;;  %v1487_v49 = vld [vmem:[%s2849_s25 + $0xe0] sm:$0xff] }
 0x6df   : > { %1518 = vmatpush.msra.mxu0 %v1487_v49  ;;  %1505 = vmatpush.msrb.mxu3 %v1461_v14 }
 0x6e0   : > { %v1334_v63 = vmul.f32 %v3079_v62, %v3079_v62 }
 0x6e1   : > { %1519 = vmatpush.msra.mxu0 %v1486_v52  ;;  %1506 = vmatpush.msrb.mxu3 %v1460_v16 }
 0x6e2   : > { %1337 = vadd.xlane.f32.xlu2 %v1334_v63 }
 0x6e3   : > { %1520 = vmatpush.msra.mxu0 %v1485_v0  ;;  %1507 = vmatpush.msrb.mxu3 %v1459_v18 }
 0x6e5   : > { %1521 = vmatpush.msra.mxu0 %v1484_v32 }
 0x6e7   : > { %1522 = vmatpush.msra.mxu0 %v1483_v60 }
 0x6e9   : > { %1523 = vmatpush.msra.mxu0 %v1482_v3 }
 0x6eb   : > { %1524 = vmatpush.msra.mxu0 %v1481_v7 }
 0x6ed   : > { %1525 = vmatpush.msra.mxu0 %v1480_v15 }
 0x6ef   : > { %1526 = vmatpush.msra.mxu0 %v1479_v17 }
 0x6f1   : > { %1527 = vmatpush.msra.mxu0 %v1478_v19 }
 0x749   : > { %v1336_v24 = vpop.xlane.xlu0 %1335 }
 0x74a   : > { %v1339_v26 = vmul.f32 %v1336_v24, %v3071_v35 }
 0x74c   : > { %v1341_v27 = vadd.f32 1e-05, %v1339_v26 }
 0x74e   : > { %2126 = vrsqrt.f32 %v1341_v27  ;;  %vm1349_vm4 = vweird.f32 %v1341_v27 }
 0x754   : > { %v2127_v34 = vpop.eup %2126 }
 0x755   : > { %v1344_v39 = vmul.f32 %v2127_v34, %v1341_v27  ;;  %v1338_v40 = vpop.xlane.xlu2 %1337  ;;  %vm1350_vm3 = vweird.f32 %v2127_v34 }
 0x756   : > { %v1340_v43 = vmul.f32 %v1338_v40, %v3071_v35  ;;  %vm1351_vm5 = vmor %vm1349_vm4, %vm1350_vm3 }
 0x757   : > { %v1345_v46 = vmul.f32 %v2127_v34, %v1344_v39 }
 0x758   : > { %v1342_v50 = vadd.f32 1e-05, %v1340_v43 }
 0x759   : > { %v1346_v51 = vmul.f32 0.5, %v1345_v46 }
 0x75a   : > { %2128 = vrsqrt.f32 %v1342_v50  ;;  %vm1359_vm7 = vweird.f32 %v1342_v50 }
 0x75b   : > { %v1347_v54 = vsub.f32 1.5, %v1346_v51 }
 0x75d   : > { %v1348_v55 = vmul.f32 %v2127_v34, %v1347_v54 }
 0x75f   : > { %v1352_v59 = vsel %vm1351_vm5, %v2127_v34, %v1348_v55 }
 0x760   : > { %v2129_v61 = vpop.eup %2128  ;;  %v1363_v63 = vmul.f32 %v1352_v59, %v3074_v58 }
 0x761   : > { %v1354_v36 = vmul.f32 %v2129_v61, %v1342_v50  ;;  %vm1360_vm6 = vweird.f32 %v2129_v61 }
 0x762   : > { %v1366_v4 = vmul.f32 %v1365_v56, %v1363_v63  ;;  %vm1361_vm8 = vmor %vm1359_vm7, %vm1360_vm6 }
 0x763   : > { %v1355_v5 = vmul.f32 %v2129_v61, %v1354_v36 }
 0x764   : > { %v3135_v6 = vadd.f32 %v1368_v1, %v1366_v4 }
 0x765   : > { %v1356_v58 = vmul.f32 0.5, %v1355_v5 }
 0x766   : > { %1425 = vmatmul.f32.vlgmr.msra.gmra.mxu1 %v3135_v6  ;;  %1448 = vmatmul.f32.vlgmr.msrb.gmra.mxu2 %v3135_v6 }
 0x767   : > { %v1357_v47 = vsub.f32 1.5, %v1356_v58 }
 0x769   : > { %v1358_v9 = vmul.f32 %v2129_v61, %v1357_v47  ;;  %v1580_v47 = vperm.slane %v3026_v25, 4 }
 0x76b   : > { %v1362_v10 = vsel %vm1361_vm8, %v2129_v61, %v1358_v9 }
 0x76c   : > { %v1364_v11 = vmul.f32 %v1362_v10, %v3079_v62  ;;  %v1477_v62 = vld [vmem:[%s2849_s25 + $0x90] sm:$0xff]  ;;  %s2388_s25 = sshra.s32 %s1606_s19, 4  ;;  %s2389_s25 = int_to_ptr.hbm [resolvable:$true] %s2388_s25 }
 0x76d   : > { %1528 = vmatpush.msra.mxu0 %v1477_v62  ;;  %s2390_s4 = scalar_lea.hbm %s2389_s25, 16  ;;  %p2395_p0 = scmp.lt.s32.totalorder %s2389_s25, %s3302_s7 }
 0x76e   : > { %v1367_v12 = vmul.f32 %v1365_v56, %v1364_v11  ;;  %v1583_v11 = vperm.slane %v3026_v25, 5  ;;  %p2391_p8 = scmp.ne.s32.totalorder %s2389_s25, %s2390_s4  ;;  %p2396_p2 = scmp.lt.s32.totalorder %s2394_s27, %s2390_s4 }
 0x76f   : > { %1529 = vmatpush.msra.mxu0 %v1476_v20 }
 0x770   : > { %v1370_v13 = vadd.f32 %v1368_v1, %v1367_v12  ;;  %p2392_p10 = pnand %p2391_p8, %p3304_p9  ;;  %p2397_p4 = por %p2396_p2, %p2395_p0 }
 0x771   : > { %1530 = vmatpush.msra.mxu0 %v1475_v21 }
 0x772   : > { %1428 = vmatmul.f32.gmra.mxu1 %v1370_v13  ;;  %1451 = vmatmul.f32.gmra.mxu2 %v1370_v13  ;;  %p2393_p11 = pneg %p2392_p10 }
 0x774   : > { %p2398_p5 = pnand %p2397_p4, %p2393_p11 }
 0x7e3   : > { %v1426_v24 = vpop.f32.mrf.mxu1 }
 0x7e4   : > { %v1427_v26 = vadd.f32 %v1426_v24, %v1405_v23 }
 0x7e6   : > { %v1455_v27 = vmax.f32 %v1427_v26, 0.0 }
 0x7e8   : > { %1508 = vmatmul.f32.vlgmr.msrb.gmra.mxu3 %v1455_v27 }
 0x7e9   : > { %v1449_v30 = vpop.f32.mrf.mxu2 }
 0x7ea   : > { %v1450_v31 = vadd.f32 %v1449_v30, %v1406_v28 }
 0x7ec   : > { %v1456_v34 = vmax.f32 %v1450_v31, 0.0 }
 0x7ee   : > { %1531 = vmatmul.f32.vlgmr.msra.gmra.mxu0 %v1456_v34 }
 0x7ef   : > { %v1429_v37 = vpop.f32.mrf.mxu1 }
 0x7f0   : > { %v1430_v38 = vadd.f32 %v1429_v37, %v1405_v23 }
 0x7f2   : > { %v1457_v39 = vmax.f32 %v1430_v38, 0.0 }
 0x7f4   : > { %1511 = vmatmul.f32.gmra.mxu3 %v1457_v39 }
 0x7f5   : > { %v1452_v40 = vpop.f32.mrf.mxu2 }
 0x7f6   : > { %v1453_v42 = vadd.f32 %v1452_v40, %v1406_v28 }
 0x7f8   : > { %v1458_v43 = vmax.f32 %v1453_v42, 0.0 }
 0x7fa   : > { %1534 = vmatmul.f32.gmra.mxu0 %v1458_v43 }
 0x86b   : > { %v1509_v46 = vpop.f32.mrf.mxu3  ;;  %v1532_v50 = vpop.f32.mrf.mxu0 }
 0x86c   : > { %v1510_v49 = vadd.f32 %v1509_v46, %v1491_v45 }
 0x86e   : > { %v1533_v29 = vadd.f32 %v1532_v50, %v1510_v49 }
 0x870   : > { %v1538_v51 = vadd.f32 %v1533_v29, %v3135_v6 }
 0x872   : > { %1540 = vadd.xlane.f32.xlu0 %v1538_v51 }
 0x877   : > { %v1512_v52 = vpop.f32.mrf.mxu3  ;;  %v1535_v54 = vpop.f32.mrf.mxu0 }
 0x878   : > { %v1513_v53 = vadd.f32 %v1512_v52, %v1491_v45 }
 0x87a   : > { %v1536_v0 = vadd.f32 %v1535_v54, %v1513_v53 }
 0x87c   : > { %v1539_v33 = vadd.f32 %v1536_v0, %v1370_v13 }
 0x87e   : > { %1542 = vadd.xlane.f32.xlu0 %v1539_v33 }
 0x8e5   : > { %v1541_v55 = vpop.xlane.xlu0 %1540 }
 0x8e6   : > { %v1544_v32 = vmul.f32 %v1541_v55, %v3071_v35 }
 0x8e8   : > { %v1546_v56 = vsub.f32 %v1538_v51, %v1544_v32 }
 0x8ea   : > { %v1548_v57 = vmul.f32 %v1546_v56, %v1546_v56 }
 0x8ec   : > { %1550 = vadd.xlane.f32.xlu0 %v1548_v57 }
 0x8f1   : > { %v1543_v59 = vpop.xlane.xlu0 %1542 }
 0x8f2   : > { %v1545_v60 = vmul.f32 %v1543_v59, %v3071_v35 }
 0x8f4   : > { %v1547_v61 = vsub.f32 %v1539_v33, %v1545_v60 }
 0x8f6   : > { %v1549_v63 = vmul.f32 %v1547_v61, %v1547_v61 }
 0x8f8   : > { %1552 = vadd.xlane.f32.xlu0 %v1549_v63 }
 0x95f   : > { %v1551_v1 = vpop.xlane.xlu0 %1550 }
 0x960   : > { %v1554_v2 = vmul.f32 %v1551_v1, %v3071_v35 }
 0x962   : > { %v1556_v36 = vadd.f32 1e-05, %v1554_v2 }
 0x964   : > { %2130 = vrsqrt.f32 %v1556_v36  ;;  %vm1564_vm10 = vweird.f32 %v1556_v36 }
 0x96a   : > { %v2131_v3 = vpop.eup %2130 }
 0x96b   : > { %v1559_v4 = vmul.f32 %v2131_v3, %v1556_v36  ;;  %v1553_v44 = vpop.xlane.xlu0 %1552  ;;  %vm1565_vm9 = vweird.f32 %v2131_v3 }
 0x96c   : > { %v1555_v5 = vmul.f32 %v1553_v44, %v3071_v35  ;;  %vm1566_vm11 = vmor %vm1564_vm10, %vm1565_vm9 }
 0x96d   : > { %v1560_v6 = vmul.f32 %v2131_v3, %v1559_v4 }
 0x96e   : > { %v1557_v41 = vadd.f32 1e-05, %v1555_v5 }
 0x96f   : > { %v1561_v7 = vmul.f32 0.5, %v1560_v6 }
 0x970   : > { %2132 = vrsqrt.f32 %v1557_v41  ;;  %vm1574_vm13 = vweird.f32 %v1557_v41 }
 0x971   : > { %v1562_v58 = vsub.f32 1.5, %v1561_v7 }
 0x973   : > { %v1563_v48 = vmul.f32 %v2131_v3, %v1562_v58 }
 0x975   : > { %v1567_v8 = vsel %vm1566_vm11, %v2131_v3, %v1563_v48 }
 0x976   : > { %v2133_v9 = vpop.eup %2132  ;;  %v1578_v10 = vmul.f32 %v1567_v8, %v1546_v56 }
 0x977   : > { %v1569_v12 = vmul.f32 %v2133_v9, %v1557_v41  ;;  %vm1575_vm12 = vweird.f32 %v2133_v9 }
 0x978   : > { %v1581_v35 = vmul.f32 %v1580_v47, %v1578_v10  ;;  %vm1576_vm14 = vmor %vm1574_vm13, %vm1575_vm12 }
 0x979   : > { %v1570_v13 = vmul.f32 %v2133_v9, %v1569_v12 }
 0x97a   : > { %v1584_v14 = vadd.f32 %v1583_v11, %v1581_v35 }
 0x97b   : > { %v1571_v15 = vmul.f32 0.5, %v1570_v13 }
 0x97c   : > { %1586 = vst [vmem:[#allocation2] sm:$0xff] %v1584_v14 }
 0x97d   : > { %v1572_v16 = vsub.f32 1.5, %v1571_v15  ;;  %1588 = vst [vmem:[%s2864_s13] sm:$0xff] %v1584_v14 }
 0x97f   : > { %v1573_v17 = vmul.f32 %v2133_v9, %v1572_v16 }
 0x981   : > { %v1577_v25 = vsel %vm1576_vm14, %v2133_v9, %v1573_v17 }
 0x982   : > { %v1579_v18 = vmul.f32 %v1577_v25, %v1547_v61 }
 0x984   : > { %v1582_v19 = vmul.f32 %v1580_v47, %v1579_v18 }
 0x986   : > { %v1585_v62 = vadd.f32 %v1583_v11, %v1582_v19 }
 0x988   : > { %1587 = vst [vmem:[#allocation2 + $0x8] sm:$0xff] %v1585_v62 }
 0x989   : > { %1589 = vst [vmem:[%s2864_s13 + $0x8] sm:$0xff] %v1585_v62 }
 0x98a   : > { %2401 = shalt.err (!%p2398_p5)
}
 0x98b   : > { %s2528_s15 = smov 128   ;;  %s2529_s26 = smov 8  }
 0x98c   : > { %1944 = dma.vmem_to_hbm [thread:$0]  (%p3304_p9), %s1604_s28, 256, %s1606_s19, %s1591_s2, %s2528_s15, %s2528_s15, %s2529_s26  }
 0x98d PF: > { %s3305_s13 = sld [smem:[#allocation30_spill]] }
 0x98e   : > { %s3306_s12 = sld [smem:[#allocation26_spill]] }
 0x98f   : > { %s3307_s10 = sld [smem:[#allocation34_spill]] }
 0x993   : > { %p1976_p7 = scmp.ge.s32.totalorder %s3305_s13, 2 }
 0x994   : > { %s1620_s3 = sand.u32 1, %s3306_s12  }
 0x995   : > { %p3308_p12 = scmp.ne.s32.totalorder %s3307_s10, 0  ;;  %s1621_s20 = scalar_lea.sflag [#allocation5], %s1620_s3 }
 0x997   : > { %p1972_p13 = pnand %p1976_p7, %p3308_p12 }
 0x999   : > { %p1973_p1 = pneg %p1972_p13 }
 0x99b   : > { %2471 = dma.done.wait (%p1973_p1), %s1621_s20, 256  }
 0x99c   : > { %2473 = vsyncadd (%p1973_p1), %s1621_s20, 4294967040  ;;  %s37_s19 = sadd.s32 1, %s3305_s13   ;;  %s3309_s30 = sld [smem:[#allocation25_spill]] }
 0x99d   : > { %p34_p3 = scmp.ge.s32.totalorder %s37_s19, 6   ;;  %s3310_s12 = sld [smem:[#allocation27_spill]] }
 0x99e   : > { %s3311_s29 = sld [smem:[#allocation38_spill]]  ;;  %s3314_s10 = smov %s2484_s11 }
 0x99f   : > { %s3312_s9 = sld [smem:[#allocation35_spill]]  ;;  %s3315_s11 = smov %s2729_s21 }
 0x9a0   : > { %s3313_s0 = sld [smem:[#allocation37_spill]]  ;;  %s3316_s13 = smov %s2496_s14 }
 0x9a1   : > { %s3318_s15 = smov %s2508_s17  ;;  %s3319_s16 = smov %s2512_s18 }
 0x9a2   :  { %36 = sbr.rel (!%p34_p3) target bundleno = 25 (0x19), region = 193 }
 0x9a4   : > { %s3317_s14 = smov %s3311_s29 }
 0x9a5   : > { %s3320_s17 = smov %s3312_s9 }
 0x9a6   : > { %s3321_s18 = smov %s3313_s0 }
 0x9a7   :  { %1627 = vsyncpa [#allocation4], 1 }
 0x9a8   :  { %1629 = vsyncpa [#allocation4 + $0x1], 1 }
 0x9a9   :  { %1630 = vsyncpa [#allocation7], 1 }
 0x9aa   :  { %1632 = vsyncpa [#allocation7 + $0x1], 1 }
 0x9ab   :  { %1633 = vsyncpa [#allocation10], 1 }
 0x9ac   :  { %1635 = vsyncpa [#allocation10 + $0x1], 1 }
 0x9ad   :  { %1636 = vsyncpa [#allocation13], 1 }
 0x9ae   :  { %1638 = vsyncpa [#allocation13 + $0x1], 1 }
 0x9af   :  { %1639 = vsyncpa [#allocation16], 1 }
 0x9b0   :  { %1641 = vsyncpa [#allocation16 + $0x1], 1 }
 0x9b1   :  { %1642 = vsyncpa [#allocation5], 1 }
 0x9b2   :  { %1644 = vsyncpa [#allocation5 + $0x1], 1 }

</bundles_post_ra>
